<compile_context>
chip_gen: v7x
topology: tpu7x:2x2x1
jax: 0.10.0
libtpu: 0.0.40
codegen_flags: <defaults>
</compile_context>

<pallas_src>
import jax
import jax.numpy as jnp
from jax.experimental import pallas as pl
from jax.experimental.pallas import tpu as pltpu

# ---------------- scaled-down ViT config ----------------
IMG = 32          # image spatial size
PATCH = 16        # patch size
IN_CH = 3         # PNG sketches are 3-channel
EMBED = 32        # hidden_dim (vit embed_dim), scaled down from 768
DEPTH = 2         # transformer depth, scaled down from 12
HEADS = 4
HEAD_DIM = EMBED // HEADS
MLP_HID = 4 * EMBED
OUT_DIM = 64      # output_dim, scaled down from 512
BATCH = 2
GRID_P = IMG // PATCH
NUM_PATCHES = GRID_P * GRID_P
SEQ = NUM_PATCHES + 1          # CLS + patches = 5
SEQ_PAD = 8                    # padded so each batch is one (8,128) sublane tile
ROWS = BATCH * SEQ_PAD         # 16
PATCH_DIM = IN_CH * PATCH * PATCH
LN_EPS = 1e-6

# ---------------- packed-slab layout constants ----------------
# slab_a: [PATCH_DIM + DEPTH*MLP_HID, EMBED] = [1024, 32]  (patch_w, w_fc2 x DEPTH)
# slab_b: [EMBED, SLAB_B_LANES]              = [32, 608]   (per-depth w_qkv|w_proj|w_fc1, then hw1|hw2)
# small : [ROWS, SMALL_LANES]                = [16, 176]   (bias rows | tok_bias | attn_bias)
DSTRIDE = 3 * EMBED + EMBED + MLP_HID        # 256 lanes of slab_b per depth
HEAD_OFF = DEPTH * DSTRIDE                   # 512
SLAB_B_LANES = HEAD_OFF + EMBED + OUT_DIM    # 608
BIAS_LANES = 128                             # bias-row region width in `small`
SMALL_LANES = BIAS_LANES + EMBED + ROWS      # 176


def _vmem():
    return pl.BlockSpec(memory_space=pltpu.MemorySpace.VMEM)


def _ln(x, eps=LN_EPS):
    # LayerNorm with gamma/beta folded into the following matmul -> core only.
    mu = jnp.mean(x, axis=-1, keepdims=True)
    var = jnp.mean((x - mu) ** 2, axis=-1, keepdims=True)
    return (x - mu) * jax.lax.rsqrt(var + eps)


def _mm(a, b):
    # bf16 MXU operands, f32 accumulation (v5e MXU is bf16-only)
    return jnp.dot(a.astype(jnp.bfloat16), b.astype(jnp.bfloat16),
                   preferred_element_type=jnp.float32)


def _mm_t(a, b):
    # a @ b.T without materializing the transpose (contract last dims)
    return jax.lax.dot_general(a.astype(jnp.bfloat16), b.astype(jnp.bfloat16),
                               (((1,), (1,)), ((), ())),
                               preferred_element_type=jnp.float32)


# ---------------- fully fused encoder kernel ----------------
def _encoder_kernel(patches_ref, wa_ref, wb_ref, sm_ref, o_ref):
    # precomputed additive slabs (all f32)
    tok_bias = sm_ref[:, BIAS_LANES:BIAS_LANES + EMBED]                    # [ROWS, EMBED]
    attn_bias = sm_ref[:, BIAS_LANES + EMBED:BIAS_LANES + EMBED + ROWS]    # [ROWS, ROWS]

    # ---- patch embed for all B*SEQ_PAD rows (CLS / pad rows are zero in patches);
    #      CLS token + pos-embed + conv bias folded into tok_bias.
    x = _mm(patches_ref[...], wa_ref[0:PATCH_DIM, :]) + tok_bias           # [ROWS, EMBED] f32

    # ---- transformer blocks (static unroll over DEPTH) ----
    for d in range(DEPTH):
        ob = d * DSTRIDE
        w_qkv = wb_ref[:, ob:ob + 3 * EMBED]                               # [32, 96] (LN1 g + 1/sqrt(hd) folded)
        w_proj = wb_ref[:, ob + 3 * EMBED:ob + 4 * EMBED]                  # [32, 32]
        w_fc1 = wb_ref[:, ob + 4 * EMBED:ob + 4 * EMBED + MLP_HID]         # [32, 128] (LN2 g folded)
        w_fc2 = wa_ref[PATCH_DIM + d * MLP_HID:PATCH_DIM + (d + 1) * MLP_HID, :]  # [128, 32]
        br = 4 * d
        b_qkv = sm_ref[br:br + 1, 0:3 * EMBED]
        b_proj = sm_ref[br + 1:br + 2, 0:EMBED]
        b_fc1 = sm_ref[br + 2:br + 3, 0:MLP_HID]
        b_fc2 = sm_ref[br + 3:br + 4, 0:EMBED]

        # attention branch (one qkv matmul for all 16 rows)
        h = _ln(x)
        qkv = _mm(h, w_qkv) + b_qkv                                        # [ROWS, 3*EMBED]
        heads = []
        for hd in range(HEADS):                                            # static unroll, 2-D slices only
            lo = hd * HEAD_DIM
            q_h = qkv[:, lo:lo + HEAD_DIM]                                 # [16, 8] (scale pre-folded)
            k_h = qkv[:, EMBED + lo:EMBED + lo + HEAD_DIM]
            v_h = qkv[:, 2 * EMBED + lo:2 * EMBED + lo + HEAD_DIM]
            # one [16,16] score matmul; batch-block + key-pad mask via f32 additive bias
            s = _mm_t(q_h, k_h) + attn_bias
            s = s - jnp.max(s, axis=-1, keepdims=True)                     # cheap XLU reduce, overflow-safe
            p = jnp.exp(s)
            p = p * pl.reciprocal(jnp.sum(p, axis=-1, keepdims=True), approx=True)
            heads.append(_mm(p, v_h))                                      # [16, 8]
        ah = jnp.concatenate(heads, axis=-1)                               # [ROWS, EMBED] lane placement
        x = x + _mm(ah, w_proj) + b_proj                                   # ONE output projection

        # MLP branch (intermediate is lane-dense: MLP_HID = 128)
        h2 = _ln(x)
        m = _mm(h2, w_fc1) + b_fc1
        # TODO(synk): timm ViT uses exact (erf) GELU; tanh approximation used here.
        m = jax.nn.gelu(m, approximate=True)
        x = x + _mm(m, w_fc2) + b_fc2

    # ---- CLS extraction via static row slices (no select matmul) ----
    cls = jnp.concatenate([x[b * SEQ_PAD:b * SEQ_PAD + 1, :] for b in range(BATCH)],
                          axis=0)                                          # [BATCH, EMBED]
    cls = _ln(cls)                                                         # final LN (affine folded into hw1)

    hw1 = wb_ref[:, HEAD_OFF:HEAD_OFF + EMBED]                             # [32, 32]
    hw2 = wb_ref[:, HEAD_OFF + EMBED:HEAD_OFF + EMBED + OUT_DIM]           # [32, 64]
    hb1 = sm_ref[4 * DEPTH:4 * DEPTH + 1, 0:EMBED]
    hb2 = sm_ref[4 * DEPTH + 1:4 * DEPTH + 2, 0:OUT_DIM]

    hproj = jnp.maximum(_mm(cls, hw1) + hb1, 0.0)                          # Linear + ReLU
    # TODO(synk): Dropout layers are identity (inference mode).
    y = _mm(hproj, hw2) + hb2                                              # [BATCH, OUT_DIM]
    nrm = jnp.sqrt(jnp.sum(y * y, axis=-1, keepdims=True))
    o_ref[...] = (y / jnp.maximum(nrm, 1e-12)).astype(o_ref.dtype)         # F.normalize p=2


def encoder_call(patches, params):
    args = (patches, params["slab_a"], params["slab_b"], params["small"])
    return pl.pallas_call(
        _encoder_kernel,
        out_shape=jax.ShapeDtypeStruct((BATCH, OUT_DIM), jnp.float32),
        in_specs=[_vmem()] * len(args),
        out_specs=_vmem(),
    )(*args)


# ---------------- parameter init + packing (deterministic, synthetic) ----------------
def _xavier_uniform(key, fan_in, fan_out):
    bound = float(jnp.sqrt(6.0 / (fan_in + fan_out)))
    return jax.random.uniform(key, (fan_in, fan_out), jnp.float32, -bound, bound)


def init_params(key):
    ks = iter(jax.random.split(key, 64))

    patch_w = 0.02 * jax.random.normal(next(ks), (PATCH_DIM, EMBED), jnp.float32)
    patch_b = jnp.zeros((EMBED,), jnp.float32)
    cls_token = 0.02 * jax.random.normal(next(ks), (1, EMBED), jnp.float32)
    pos_embed = 0.02 * jax.random.normal(next(ks), (SEQ, EMBED), jnp.float32)

    scale = 1.0 / (HEAD_DIM ** 0.5)
    w_qkv_f, b_qkv_f, w_proj_l, b_proj_l = [], [], [], []
    w_fc1_f, b_fc1_f, w_fc2_l, b_fc2_l = [], [], [], []
    for _ in range(DEPTH):
        ln1_g = jnp.ones((EMBED,), jnp.float32)
        ln1_b = jnp.zeros((EMBED,), jnp.float32)
        ln2_g = jnp.ones((EMBED,), jnp.float32)
        ln2_b = jnp.zeros((EMBED,), jnp.float32)

        w_qkv = 0.02 * jax.random.normal(next(ks), (EMBED, 3 * EMBED), jnp.float32)
        b_qkv = jnp.zeros((3 * EMBED,), jnp.float32)
        # fold LN1 affine into qkv, then fold attention scale into Q columns
        wq = ln1_g[:, None] * w_qkv
        bq = b_qkv + ln1_b @ w_qkv
        wq = wq.at[:, :EMBED].multiply(scale)
        bq = bq.at[:EMBED].multiply(scale)
        w_qkv_f.append(wq)
        b_qkv_f.append(bq)

        w_proj_l.append(0.02 * jax.random.normal(next(ks), (EMBED, EMBED), jnp.float32))
        b_proj_l.append(jnp.zeros((EMBED,), jnp.float32))

        w_fc1 = 0.02 * jax.random.normal(next(ks), (EMBED, MLP_HID), jnp.float32)
        b_fc1 = jnp.zeros((MLP_HID,), jnp.float32)
        w_fc1_f.append(ln2_g[:, None] * w_fc1)          # fold LN2 affine
        b_fc1_f.append(b_fc1 + ln2_b @ w_fc1)

        w_fc2_l.append(0.02 * jax.random.normal(next(ks), (MLP_HID, EMBED), jnp.float32))
        b_fc2_l.append(jnp.zeros((EMBED,), jnp.float32))

    # final LN affine folded into first projection-head Linear
    lnf_g = jnp.ones((EMBED,), jnp.float32)
    lnf_b = jnp.zeros((EMBED,), jnp.float32)
    hw1 = _xavier_uniform(next(ks), EMBED, EMBED)        # projection head (xavier, zero bias)
    hb1 = jnp.zeros((EMBED,), jnp.float32)
    hw2 = _xavier_uniform(next(ks), EMBED, OUT_DIM)
    hb2 = jnp.zeros((OUT_DIM,), jnp.float32)
    hw1_f = lnf_g[:, None] * hw1
    hb1_f = hb1 + lnf_b @ hw1

    # ---- slab A: [PATCH_DIM + DEPTH*MLP_HID, EMBED] (row-stacked 32-lane weights)
    slab_a = jnp.concatenate([patch_w] + w_fc2_l, axis=0)

    # ---- slab B: [EMBED, 608] (lane-stacked per-depth weights + projection head)
    segs = []
    for d in range(DEPTH):
        segs += [w_qkv_f[d], w_proj_l[d], w_fc1_f[d]]
    segs += [hw1_f, hw2]
    slab_b = jnp.concatenate(segs, axis=1)
    assert slab_b.shape == (EMBED, SLAB_B_LANES), slab_b.shape

    # ---- small slab: [ROWS, 176] = bias rows (128) | tok_bias (32) | attn_bias (16)
    bias_rows = jnp.zeros((ROWS, BIAS_LANES), jnp.float32)
    for d in range(DEPTH):
        bias_rows = bias_rows.at[4 * d + 0, 0:3 * EMBED].set(b_qkv_f[d])
        bias_rows = bias_rows.at[4 * d + 1, 0:EMBED].set(b_proj_l[d])
        bias_rows = bias_rows.at[4 * d + 2, 0:MLP_HID].set(b_fc1_f[d])
        bias_rows = bias_rows.at[4 * d + 3, 0:EMBED].set(b_fc2_l[d])
    bias_rows = bias_rows.at[4 * DEPTH + 0, 0:EMBED].set(hb1_f)
    bias_rows = bias_rows.at[4 * DEPTH + 1, 0:OUT_DIM].set(hb2)

    # CLS token + positional embedding + patch-embed bias folded into one additive slab
    block_bias = jnp.concatenate(
        [cls_token + pos_embed[0:1],
         pos_embed[1:SEQ] + patch_b[None, :],
         jnp.zeros((SEQ_PAD - SEQ, EMBED), jnp.float32)], axis=0)          # [SEQ_PAD, EMBED]
    tok_bias = jnp.tile(block_bias, (BATCH, 1))                            # [ROWS, EMBED]

    # additive attention bias: block-diagonal batch mask AND key-padding mask (f32)
    row_batch = jnp.arange(ROWS) // SEQ_PAD
    col_batch = jnp.arange(ROWS) // SEQ_PAD
    col_valid = (jnp.arange(ROWS) % SEQ_PAD) < SEQ
    ok = (row_batch[:, None] == col_batch[None, :]) & col_valid[None, :]
    attn_bias = jnp.where(ok, 0.0, -1e9).astype(jnp.float32)               # [ROWS, ROWS]

    small = jnp.concatenate([bias_rows, tok_bias, attn_bias], axis=1)
    assert small.shape == (ROWS, SMALL_LANES), small.shape

    return {"slab_a": slab_a, "slab_b": slab_b, "small": small}


# ---------------- forward (im2col glue in JAX, everything else in one Pallas call) ----
def _forward(sketch_images, params):
    # sketch_images: NCHW [B, 3, IMG, IMG]  (matches PyTorch input convention)
    b = sketch_images.shape[0]
    # im2col patch extraction: [B, C, gh, P, gw, P] -> [B, N, C*P*P]
    x = sketch_images.reshape(b, IN_CH, GRID_P, PATCH, GRID_P, PATCH)
    x = x.transpose(0, 2, 4, 1, 3, 5).reshape(b, NUM_PATCHES, PATCH_DIM)
    # row layout expected by the kernel: [CLS slot (zeros), patches, pad rows]
    x = jnp.pad(x, ((0, 0), (1, SEQ_PAD - 1 - NUM_PATCHES), (0, 0)))
    x = x.reshape(b * SEQ_PAD, PATCH_DIM)
    return encoder_call(x, params)                 # [B, OUT_DIM], L2-normalized


png_sketch_encoder_forward = jax.jit(_forward)


if __name__ == "__main__":
    key = jax.random.PRNGKey(0)
    k_img, k_param = jax.random.split(key)
    sketch_images = jax.random.uniform(k_img, (BATCH, IN_CH, IMG, IMG), jnp.float32)
    params = init_params(k_param)

    out = png_sketch_encoder_forward(sketch_images, params)
    out = jax.block_until_ready(out)

    assert out.shape == (BATCH, OUT_DIM), out.shape
    # sanity: rows are L2-normalized
    norms = jnp.linalg.norm(out, axis=-1)
    assert bool(jnp.all(jnp.abs(norms - 1.0) < 1e-3)), norms
    print("KERNEL_OK")
</pallas_src>

<mosaic_0001>
module attributes {stable_mosaic.version = 11 : i64} {
  func.func @_encoder_kernel(%arg0: memref<16x768xf32, #tpu.memory_space<vmem>>, %arg1: memref<1024x32xf32, #tpu.memory_space<vmem>>, %arg2: memref<32x608xf32, #tpu.memory_space<vmem>>, %arg3: memref<16x176xf32, #tpu.memory_space<vmem>>, %arg4: memref<2x64xf32, #tpu.memory_space<vmem>>) attributes {dimension_semantics = [], scalar_prefetch = 0 : i64, scratch_operands = 0 : i64, tpu.core_type = #tpu.core_type<tc>} {
    %c0 = arith.constant 0 : index
    %c128 = arith.constant 128 : index
    %0 = vector.load %arg3[%c0, %c128] : memref<16x176xf32, #tpu.memory_space<vmem>>, vector<16x32xf32>
    %c0_0 = arith.constant 0 : index
    %c160 = arith.constant 160 : index
    %1 = vector.load %arg3[%c0_0, %c160] : memref<16x176xf32, #tpu.memory_space<vmem>>, vector<16x16xf32>
    %c0_1 = arith.constant 0 : index
    %c0_2 = arith.constant 0 : index
    %2 = vector.load %arg0[%c0_1, %c0_2] : memref<16x768xf32, #tpu.memory_space<vmem>>, vector<16x768xf32>
    %c0_3 = arith.constant 0 : index
    %c0_4 = arith.constant 0 : index
    %3 = vector.load %arg1[%c0_3, %c0_4] : memref<1024x32xf32, #tpu.memory_space<vmem>>, vector<768x32xf32>
    %4 = arith.truncf %2 : vector<16x768xf32> to vector<16x768xbf16>
    %5 = arith.truncf %3 : vector<768x32xf32> to vector<768x32xbf16>
    %cst = arith.constant dense<0.000000e+00> : vector<16x32xf32>
    %6 = tpu.matmul %4, %5, %cst {dimension_numbers = #tpu.dot_dimension_numbers<[1], [0], [0], [1], [0, 0, 1, 1], [], []>} : vector<16x768xbf16>, vector<768x32xbf16>, vector<16x32xf32> -> vector<16x32xf32>
    %7 = arith.addf %6, %0 : vector<16x32xf32>
    %c0_5 = arith.constant 0 : index
    %c0_6 = arith.constant 0 : index
    %8 = vector.load %arg2[%c0_5, %c0_6] : memref<32x608xf32, #tpu.memory_space<vmem>>, vector<32x96xf32>
    %c0_7 = arith.constant 0 : index
    %c96 = arith.constant 96 : index
    %9 = vector.load %arg2[%c0_7, %c96] : memref<32x608xf32, #tpu.memory_space<vmem>>, vector<32x32xf32>
    %c0_8 = arith.constant 0 : index
    %c128_9 = arith.constant 128 : index
    %10 = vector.load %arg2[%c0_8, %c128_9] : memref<32x608xf32, #tpu.memory_space<vmem>>, vector<32x128xf32>
    %c768 = arith.constant 768 : index
    %c0_10 = arith.constant 0 : index
    %11 = vector.load %arg1[%c768, %c0_10] : memref<1024x32xf32, #tpu.memory_space<vmem>>, vector<128x32xf32>
    %c0_11 = arith.constant 0 : index
    %c0_12 = arith.constant 0 : index
    %12 = vector.load %arg3[%c0_11, %c0_12] : memref<16x176xf32, #tpu.memory_space<vmem>>, vector<1x96xf32>
    %c1 = arith.constant 1 : index
    %c0_13 = arith.constant 0 : index
    %13 = vector.load %arg3[%c1, %c0_13] : memref<16x176xf32, #tpu.memory_space<vmem>>, vector<1x32xf32>
    %c2 = arith.constant 2 : index
    %c0_14 = arith.constant 0 : index
    %14 = vector.load %arg3[%c2, %c0_14] : memref<16x176xf32, #tpu.memory_space<vmem>>, vector<1x128xf32>
    %c3 = arith.constant 3 : index
    %c0_15 = arith.constant 0 : index
    %15 = vector.load %arg3[%c3, %c0_15] : memref<16x176xf32, #tpu.memory_space<vmem>>, vector<1x32xf32>
    %cst_16 = arith.constant dense<0.000000e+00> : vector<16xf32>
    %16 = vector.multi_reduction <add>, %7, %cst_16 [1] : vector<16x32xf32> to vector<16xf32>
    %17 = vector.shape_cast %16 : vector<16xf32> to vector<16x1xf32>
    %cst_17 = arith.constant 3.200000e+01 : f32
    %18 = vector.broadcast %cst_17 : f32 to vector<16x1xf32>
    %19 = arith.divf %17, %18 : vector<16x1xf32>
    %20 = vector.broadcast %19 : vector<16x1xf32> to vector<16x32xf32>
    %21 = arith.subf %7, %20 : vector<16x32xf32>
    %22 = arith.mulf %21, %21 : vector<16x32xf32>
    %cst_18 = arith.constant dense<0.000000e+00> : vector<16xf32>
    %23 = vector.multi_reduction <add>, %22, %cst_18 [1] : vector<16x32xf32> to vector<16xf32>
    %24 = vector.shape_cast %23 : vector<16xf32> to vector<16x1xf32>
    %cst_19 = arith.constant 3.200000e+01 : f32
    %25 = vector.broadcast %cst_19 : f32 to vector<16x1xf32>
    %26 = arith.divf %24, %25 : vector<16x1xf32>
    %27 = vector.broadcast %19 : vector<16x1xf32> to vector<16x32xf32>
    %28 = arith.subf %7, %27 : vector<16x32xf32>
    %cst_20 = arith.constant 9.99999997E-7 : f32
    %29 = vector.broadcast %cst_20 : f32 to vector<16x1xf32>
    %30 = arith.addf %26, %29 : vector<16x1xf32>
    %31 = math.rsqrt %30 : vector<16x1xf32>
    %32 = vector.broadcast %31 : vector<16x1xf32> to vector<16x32xf32>
    %33 = arith.mulf %28, %32 : vector<16x32xf32>
    %34 = arith.truncf %33 : vector<16x32xf32> to vector<16x32xbf16>
    %35 = arith.truncf %8 : vector<32x96xf32> to vector<32x96xbf16>
    %cst_21 = arith.constant dense<0.000000e+00> : vector<16x96xf32>
    %36 = tpu.matmul %34, %35, %cst_21 {dimension_numbers = #tpu.dot_dimension_numbers<[1], [0], [0], [1], [0, 0, 1, 1], [], []>} : vector<16x32xbf16>, vector<32x96xbf16>, vector<16x96xf32> -> vector<16x96xf32>
    %37 = vector.broadcast %12 : vector<1x96xf32> to vector<16x96xf32>
    %38 = arith.addf %36, %37 : vector<16x96xf32>
    %39 = vector.extract_strided_slice %38 {offsets = [0, 0], sizes = [16, 8], strides = [1, 1]} : vector<16x96xf32> to vector<16x8xf32>
    %40 = vector.extract_strided_slice %38 {offsets = [0, 32], sizes = [16, 8], strides = [1, 1]} : vector<16x96xf32> to vector<16x8xf32>
    %41 = vector.extract_strided_slice %38 {offsets = [0, 64], sizes = [16, 8], strides = [1, 1]} : vector<16x96xf32> to vector<16x8xf32>
    %42 = arith.truncf %39 : vector<16x8xf32> to vector<16x8xbf16>
    %43 = arith.truncf %40 : vector<16x8xf32> to vector<16x8xbf16>
    %cst_22 = arith.constant dense<0.000000e+00> : vector<16x16xf32>
    %44 = tpu.matmul %42, %43, %cst_22 {dimension_numbers = #tpu.dot_dimension_numbers<[1], [1], [0], [0], [0, 0, 1, 0], [], []>} : vector<16x8xbf16>, vector<16x8xbf16>, vector<16x16xf32> -> vector<16x16xf32>
    %45 = arith.addf %44, %1 : vector<16x16xf32>
    %cst_23 = arith.constant dense<0xFF800000> : vector<16xf32>
    %46 = vector.multi_reduction <maximumf>, %45, %cst_23 [1] : vector<16x16xf32> to vector<16xf32>
    %47 = vector.shape_cast %46 : vector<16xf32> to vector<16x1xf32>
    %48 = vector.broadcast %47 : vector<16x1xf32> to vector<16x16xf32>
    %49 = arith.subf %45, %48 : vector<16x16xf32>
    %50 = math.exp %49 : vector<16x16xf32>
    %cst_24 = arith.constant dense<0.000000e+00> : vector<16xf32>
    %51 = vector.multi_reduction <add>, %50, %cst_24 [1] : vector<16x16xf32> to vector<16xf32>
    %52 = vector.shape_cast %51 : vector<16xf32> to vector<16x1xf32>
    %53 = tpu.reciprocal %52 {approx = true} : vector<16x1xf32> -> vector<16x1xf32>
    %54 = vector.broadcast %53 : vector<16x1xf32> to vector<16x16xf32>
    %55 = arith.mulf %50, %54 : vector<16x16xf32>
    %56 = arith.truncf %55 : vector<16x16xf32> to vector<16x16xbf16>
    %57 = arith.truncf %41 : vector<16x8xf32> to vector<16x8xbf16>
    %cst_25 = arith.constant dense<0.000000e+00> : vector<16x8xf32>
    %58 = tpu.matmul %56, %57, %cst_25 {dimension_numbers = #tpu.dot_dimension_numbers<[1], [0], [0], [1], [0, 0, 1, 1], [], []>} : vector<16x16xbf16>, vector<16x8xbf16>, vector<16x8xf32> -> vector<16x8xf32>
    %59 = vector.extract_strided_slice %38 {offsets = [0, 8], sizes = [16, 8], strides = [1, 1]} : vector<16x96xf32> to vector<16x8xf32>
    %60 = vector.extract_strided_slice %38 {offsets = [0, 40], sizes = [16, 8], strides = [1, 1]} : vector<16x96xf32> to vector<16x8xf32>
    %61 = vector.extract_strided_slice %38 {offsets = [0, 72], sizes = [16, 8], strides = [1, 1]} : vector<16x96xf32> to vector<16x8xf32>
    %62 = arith.truncf %59 : vector<16x8xf32> to vector<16x8xbf16>
    %63 = arith.truncf %60 : vector<16x8xf32> to vector<16x8xbf16>
    %cst_26 = arith.constant dense<0.000000e+00> : vector<16x16xf32>
    %64 = tpu.matmul %62, %63, %cst_26 {dimension_numbers = #tpu.dot_dimension_numbers<[1], [1], [0], [0], [0, 0, 1, 0], [], []>} : vector<16x8xbf16>, vector<16x8xbf16>, vector<16x16xf32> -> vector<16x16xf32>
    %65 = arith.addf %64, %1 : vector<16x16xf32>
    %cst_27 = arith.constant dense<0xFF800000> : vector<16xf32>
    %66 = vector.multi_reduction <maximumf>, %65, %cst_27 [1] : vector<16x16xf32> to vector<16xf32>
    %67 = vector.shape_cast %66 : vector<16xf32> to vector<16x1xf32>
    %68 = vector.broadcast %67 : vector<16x1xf32> to vector<16x16xf32>
    %69 = arith.subf %65, %68 : vector<16x16xf32>
    %70 = math.exp %69 : vector<16x16xf32>
    %cst_28 = arith.constant dense<0.000000e+00> : vector<16xf32>
    %71 = vector.multi_reduction <add>, %70, %cst_28 [1] : vector<16x16xf32> to vector<16xf32>
    %72 = vector.shape_cast %71 : vector<16xf32> to vector<16x1xf32>
    %73 = tpu.reciprocal %72 {approx = true} : vector<16x1xf32> -> vector<16x1xf32>
    %74 = vector.broadcast %73 : vector<16x1xf32> to vector<16x16xf32>
    %75 = arith.mulf %70, %74 : vector<16x16xf32>
    %76 = arith.truncf %75 : vector<16x16xf32> to vector<16x16xbf16>
    %77 = arith.truncf %61 : vector<16x8xf32> to vector<16x8xbf16>
    %cst_29 = arith.constant dense<0.000000e+00> : vector<16x8xf32>
    %78 = tpu.matmul %76, %77, %cst_29 {dimension_numbers = #tpu.dot_dimension_numbers<[1], [0], [0], [1], [0, 0, 1, 1], [], []>} : vector<16x16xbf16>, vector<16x8xbf16>, vector<16x8xf32> -> vector<16x8xf32>
    %79 = vector.extract_strided_slice %38 {offsets = [0, 16], sizes = [16, 8], strides = [1, 1]} : vector<16x96xf32> to vector<16x8xf32>
    %80 = vector.extract_strided_slice %38 {offsets = [0, 48], sizes = [16, 8], strides = [1, 1]} : vector<16x96xf32> to vector<16x8xf32>
    %81 = vector.extract_strided_slice %38 {offsets = [0, 80], sizes = [16, 8], strides = [1, 1]} : vector<16x96xf32> to vector<16x8xf32>
    %82 = arith.truncf %79 : vector<16x8xf32> to vector<16x8xbf16>
    %83 = arith.truncf %80 : vector<16x8xf32> to vector<16x8xbf16>
    %cst_30 = arith.constant dense<0.000000e+00> : vector<16x16xf32>
    %84 = tpu.matmul %82, %83, %cst_30 {dimension_numbers = #tpu.dot_dimension_numbers<[1], [1], [0], [0], [0, 0, 1, 0], [], []>} : vector<16x8xbf16>, vector<16x8xbf16>, vector<16x16xf32> -> vector<16x16xf32>
    %85 = arith.addf %84, %1 : vector<16x16xf32>
    %cst_31 = arith.constant dense<0xFF800000> : vector<16xf32>
    %86 = vector.multi_reduction <maximumf>, %85, %cst_31 [1] : vector<16x16xf32> to vector<16xf32>
    %87 = vector.shape_cast %86 : vector<16xf32> to vector<16x1xf32>
    %88 = vector.broadcast %87 : vector<16x1xf32> to vector<16x16xf32>
    %89 = arith.subf %85, %88 : vector<16x16xf32>
    %90 = math.exp %89 : vector<16x16xf32>
    %cst_32 = arith.constant dense<0.000000e+00> : vector<16xf32>
    %91 = vector.multi_reduction <add>, %90, %cst_32 [1] : vector<16x16xf32> to vector<16xf32>
    %92 = vector.shape_cast %91 : vector<16xf32> to vector<16x1xf32>
    %93 = tpu.reciprocal %92 {approx = true} : vector<16x1xf32> -> vector<16x1xf32>
    %94 = vector.broadcast %93 : vector<16x1xf32> to vector<16x16xf32>
    %95 = arith.mulf %90, %94 : vector<16x16xf32>
    %96 = arith.truncf %95 : vector<16x16xf32> to vector<16x16xbf16>
    %97 = arith.truncf %81 : vector<16x8xf32> to vector<16x8xbf16>
    %cst_33 = arith.constant dense<0.000000e+00> : vector<16x8xf32>
    %98 = tpu.matmul %96, %97, %cst_33 {dimension_numbers = #tpu.dot_dimension_numbers<[1], [0], [0], [1], [0, 0, 1, 1], [], []>} : vector<16x16xbf16>, vector<16x8xbf16>, vector<16x8xf32> -> vector<16x8xf32>
    %99 = vector.extract_strided_slice %38 {offsets = [0, 24], sizes = [16, 8], strides = [1, 1]} : vector<16x96xf32> to vector<16x8xf32>
    %100 = vector.extract_strided_slice %38 {offsets = [0, 56], sizes = [16, 8], strides = [1, 1]} : vector<16x96xf32> to vector<16x8xf32>
    %101 = vector.extract_strided_slice %38 {offsets = [0, 88], sizes = [16, 8], strides = [1, 1]} : vector<16x96xf32> to vector<16x8xf32>
    %102 = arith.truncf %99 : vector<16x8xf32> to vector<16x8xbf16>
    %103 = arith.truncf %100 : vector<16x8xf32> to vector<16x8xbf16>
    %cst_34 = arith.constant dense<0.000000e+00> : vector<16x16xf32>
    %104 = tpu.matmul %102, %103, %cst_34 {dimension_numbers = #tpu.dot_dimension_numbers<[1], [1], [0], [0], [0, 0, 1, 0], [], []>} : vector<16x8xbf16>, vector<16x8xbf16>, vector<16x16xf32> -> vector<16x16xf32>
    %105 = arith.addf %104, %1 : vector<16x16xf32>
    %cst_35 = arith.constant dense<0xFF800000> : vector<16xf32>
    %106 = vector.multi_reduction <maximumf>, %105, %cst_35 [1] : vector<16x16xf32> to vector<16xf32>
    %107 = vector.shape_cast %106 : vector<16xf32> to vector<16x1xf32>
    %108 = vector.broadcast %107 : vector<16x1xf32> to vector<16x16xf32>
    %109 = arith.subf %105, %108 : vector<16x16xf32>
    %110 = math.exp %109 : vector<16x16xf32>
    %cst_36 = arith.constant dense<0.000000e+00> : vector<16xf32>
    %111 = vector.multi_reduction <add>, %110, %cst_36 [1] : vector<16x16xf32> to vector<16xf32>
    %112 = vector.shape_cast %111 : vector<16xf32> to vector<16x1xf32>
    %113 = tpu.reciprocal %112 {approx = true} : vector<16x1xf32> -> vector<16x1xf32>
    %114 = vector.broadcast %113 : vector<16x1xf32> to vector<16x16xf32>
    %115 = arith.mulf %110, %114 : vector<16x16xf32>
    %116 = arith.truncf %115 : vector<16x16xf32> to vector<16x16xbf16>
    %117 = arith.truncf %101 : vector<16x8xf32> to vector<16x8xbf16>
    %cst_37 = arith.constant dense<0.000000e+00> : vector<16x8xf32>
    %118 = tpu.matmul %116, %117, %cst_37 {dimension_numbers = #tpu.dot_dimension_numbers<[1], [0], [0], [1], [0, 0, 1, 1], [], []>} : vector<16x16xbf16>, vector<16x8xbf16>, vector<16x8xf32> -> vector<16x8xf32>
    %119 = tpu.concatenate %58, %78, %98, %118 in 1 : vector<16x8xf32>, vector<16x8xf32>, vector<16x8xf32>, vector<16x8xf32> -> vector<16x32xf32>
    %120 = arith.truncf %119 : vector<16x32xf32> to vector<16x32xbf16>
    %121 = arith.truncf %9 : vector<32x32xf32> to vector<32x32xbf16>
    %cst_38 = arith.constant dense<0.000000e+00> : vector<16x32xf32>
    %122 = tpu.matmul %120, %121, %cst_38 {dimension_numbers = #tpu.dot_dimension_numbers<[1], [0], [0], [1], [0, 0, 1, 1], [], []>} : vector<16x32xbf16>, vector<32x32xbf16>, vector<16x32xf32> -> vector<16x32xf32>
    %123 = arith.addf %7, %122 : vector<16x32xf32>
    %124 = vector.broadcast %13 : vector<1x32xf32> to vector<16x32xf32>
    %125 = arith.addf %123, %124 : vector<16x32xf32>
    %cst_39 = arith.constant dense<0.000000e+00> : vector<16xf32>
    %126 = vector.multi_reduction <add>, %125, %cst_39 [1] : vector<16x32xf32> to vector<16xf32>
    %127 = vector.shape_cast %126 : vector<16xf32> to vector<16x1xf32>
    %cst_40 = arith.constant 3.200000e+01 : f32
    %128 = vector.broadcast %cst_40 : f32 to vector<16x1xf32>
    %129 = arith.divf %127, %128 : vector<16x1xf32>
    %130 = vector.broadcast %129 : vector<16x1xf32> to vector<16x32xf32>
    %131 = arith.subf %125, %130 : vector<16x32xf32>
    %132 = arith.mulf %131, %131 : vector<16x32xf32>
    %cst_41 = arith.constant dense<0.000000e+00> : vector<16xf32>
    %133 = vector.multi_reduction <add>, %132, %cst_41 [1] : vector<16x32xf32> to vector<16xf32>
    %134 = vector.shape_cast %133 : vector<16xf32> to vector<16x1xf32>
    %cst_42 = arith.constant 3.200000e+01 : f32
    %135 = vector.broadcast %cst_42 : f32 to vector<16x1xf32>
    %136 = arith.divf %134, %135 : vector<16x1xf32>
    %137 = vector.broadcast %129 : vector<16x1xf32> to vector<16x32xf32>
    %138 = arith.subf %125, %137 : vector<16x32xf32>
    %cst_43 = arith.constant 9.99999997E-7 : f32
    %139 = vector.broadcast %cst_43 : f32 to vector<16x1xf32>
    %140 = arith.addf %136, %139 : vector<16x1xf32>
    %141 = math.rsqrt %140 : vector<16x1xf32>
    %142 = vector.broadcast %141 : vector<16x1xf32> to vector<16x32xf32>
    %143 = arith.mulf %138, %142 : vector<16x32xf32>
    %144 = arith.truncf %143 : vector<16x32xf32> to vector<16x32xbf16>
    %145 = arith.truncf %10 : vector<32x128xf32> to vector<32x128xbf16>
    %cst_44 = arith.constant dense<0.000000e+00> : vector<16x128xf32>
    %146 = tpu.matmul %144, %145, %cst_44 {dimension_numbers = #tpu.dot_dimension_numbers<[1], [0], [0], [1], [0, 0, 1, 1], [], []>} : vector<16x32xbf16>, vector<32x128xbf16>, vector<16x128xf32> -> vector<16x128xf32>
    %147 = vector.broadcast %14 : vector<1x128xf32> to vector<16x128xf32>
    %148 = arith.addf %146, %147 : vector<16x128xf32>
    %149 = arith.mulf %148, %148 : vector<16x128xf32>
    %150 = arith.mulf %148, %149 : vector<16x128xf32>
    %cst_45 = arith.constant 4.471500e-02 : f32
    %151 = vector.broadcast %cst_45 : f32 to vector<16x128xf32>
    %152 = arith.mulf %151, %150 : vector<16x128xf32>
    %153 = arith.addf %148, %152 : vector<16x128xf32>
    %cst_46 = arith.constant 0.797884583 : f32
    %154 = vector.broadcast %cst_46 : f32 to vector<16x128xf32>
    %155 = arith.mulf %154, %153 : vector<16x128xf32>
    %156 = math.tanh %155 : vector<16x128xf32>
    %cst_47 = arith.constant 1.000000e+00 : f32
    %157 = vector.broadcast %cst_47 : f32 to vector<16x128xf32>
    %158 = arith.addf %157, %156 : vector<16x128xf32>
    %cst_48 = arith.constant 5.000000e-01 : f32
    %159 = vector.broadcast %cst_48 : f32 to vector<16x128xf32>
    %160 = arith.mulf %159, %158 : vector<16x128xf32>
    %161 = arith.mulf %148, %160 : vector<16x128xf32>
    %162 = arith.truncf %161 : vector<16x128xf32> to vector<16x128xbf16>
    %163 = arith.truncf %11 : vector<128x32xf32> to vector<128x32xbf16>
    %cst_49 = arith.constant dense<0.000000e+00> : vector<16x32xf32>
    %164 = tpu.matmul %162, %163, %cst_49 {dimension_numbers = #tpu.dot_dimension_numbers<[1], [0], [0], [1], [0, 0, 1, 1], [], []>} : vector<16x128xbf16>, vector<128x32xbf16>, vector<16x32xf32> -> vector<16x32xf32>
    %165 = arith.addf %125, %164 : vector<16x32xf32>
    %166 = vector.broadcast %15 : vector<1x32xf32> to vector<16x32xf32>
    %167 = arith.addf %165, %166 : vector<16x32xf32>
    %c0_50 = arith.constant 0 : index
    %c256 = arith.constant 256 : index
    %168 = vector.load %arg2[%c0_50, %c256] : memref<32x608xf32, #tpu.memory_space<vmem>>, vector<32x96xf32>
    %c0_51 = arith.constant 0 : index
    %c352 = arith.constant 352 : index
    %169 = vector.load %arg2[%c0_51, %c352] : memref<32x608xf32, #tpu.memory_space<vmem>>, vector<32x32xf32>
    %c0_52 = arith.constant 0 : index
    %c384 = arith.constant 384 : index
    %170 = vector.load %arg2[%c0_52, %c384] : memref<32x608xf32, #tpu.memory_space<vmem>>, vector<32x128xf32>
    %c896 = arith.constant 896 : index
    %c0_53 = arith.constant 0 : index
    %171 = vector.load %arg1[%c896, %c0_53] : memref<1024x32xf32, #tpu.memory_space<vmem>>, vector<128x32xf32>
    %c4 = arith.constant 4 : index
    %c0_54 = arith.constant 0 : index
    %172 = vector.load %arg3[%c4, %c0_54] : memref<16x176xf32, #tpu.memory_space<vmem>>, vector<1x96xf32>
    %c5 = arith.constant 5 : index
    %c0_55 = arith.constant 0 : index
    %173 = vector.load %arg3[%c5, %c0_55] : memref<16x176xf32, #tpu.memory_space<vmem>>, vector<1x32xf32>
    %c6 = arith.constant 6 : index
    %c0_56 = arith.constant 0 : index
    %174 = vector.load %arg3[%c6, %c0_56] : memref<16x176xf32, #tpu.memory_space<vmem>>, vector<1x128xf32>
    %c7 = arith.constant 7 : index
    %c0_57 = arith.constant 0 : index
    %175 = vector.load %arg3[%c7, %c0_57] : memref<16x176xf32, #tpu.memory_space<vmem>>, vector<1x32xf32>
    %cst_58 = arith.constant dense<0.000000e+00> : vector<16xf32>
    %176 = vector.multi_reduction <add>, %167, %cst_58 [1] : vector<16x32xf32> to vector<16xf32>
    %177 = vector.shape_cast %176 : vector<16xf32> to vector<16x1xf32>
    %cst_59 = arith.constant 3.200000e+01 : f32
    %178 = vector.broadcast %cst_59 : f32 to vector<16x1xf32>
    %179 = arith.divf %177, %178 : vector<16x1xf32>
    %180 = vector.broadcast %179 : vector<16x1xf32> to vector<16x32xf32>
    %181 = arith.subf %167, %180 : vector<16x32xf32>
    %182 = arith.mulf %181, %181 : vector<16x32xf32>
    %cst_60 = arith.constant dense<0.000000e+00> : vector<16xf32>
    %183 = vector.multi_reduction <add>, %182, %cst_60 [1] : vector<16x32xf32> to vector<16xf32>
    %184 = vector.shape_cast %183 : vector<16xf32> to vector<16x1xf32>
    %cst_61 = arith.constant 3.200000e+01 : f32
    %185 = vector.broadcast %cst_61 : f32 to vector<16x1xf32>
    %186 = arith.divf %184, %185 : vector<16x1xf32>
    %187 = vector.broadcast %179 : vector<16x1xf32> to vector<16x32xf32>
    %188 = arith.subf %167, %187 : vector<16x32xf32>
    %cst_62 = arith.constant 9.99999997E-7 : f32
    %189 = vector.broadcast %cst_62 : f32 to vector<16x1xf32>
    %190 = arith.addf %186, %189 : vector<16x1xf32>
    %191 = math.rsqrt %190 : vector<16x1xf32>
    %192 = vector.broadcast %191 : vector<16x1xf32> to vector<16x32xf32>
    %193 = arith.mulf %188, %192 : vector<16x32xf32>
    %194 = arith.truncf %193 : vector<16x32xf32> to vector<16x32xbf16>
    %195 = arith.truncf %168 : vector<32x96xf32> to vector<32x96xbf16>
    %cst_63 = arith.constant dense<0.000000e+00> : vector<16x96xf32>
    %196 = tpu.matmul %194, %195, %cst_63 {dimension_numbers = #tpu.dot_dimension_numbers<[1], [0], [0], [1], [0, 0, 1, 1], [], []>} : vector<16x32xbf16>, vector<32x96xbf16>, vector<16x96xf32> -> vector<16x96xf32>
    %197 = vector.broadcast %172 : vector<1x96xf32> to vector<16x96xf32>
    %198 = arith.addf %196, %197 : vector<16x96xf32>
    %199 = vector.extract_strided_slice %198 {offsets = [0, 0], sizes = [16, 8], strides = [1, 1]} : vector<16x96xf32> to vector<16x8xf32>
    %200 = vector.extract_strided_slice %198 {offsets = [0, 32], sizes = [16, 8], strides = [1, 1]} : vector<16x96xf32> to vector<16x8xf32>
    %201 = vector.extract_strided_slice %198 {offsets = [0, 64], sizes = [16, 8], strides = [1, 1]} : vector<16x96xf32> to vector<16x8xf32>
    %202 = arith.truncf %199 : vector<16x8xf32> to vector<16x8xbf16>
    %203 = arith.truncf %200 : vector<16x8xf32> to vector<16x8xbf16>
    %cst_64 = arith.constant dense<0.000000e+00> : vector<16x16xf32>
    %204 = tpu.matmul %202, %203, %cst_64 {dimension_numbers = #tpu.dot_dimension_numbers<[1], [1], [0], [0], [0, 0, 1, 0], [], []>} : vector<16x8xbf16>, vector<16x8xbf16>, vector<16x16xf32> -> vector<16x16xf32>
    %205 = arith.addf %204, %1 : vector<16x16xf32>
    %cst_65 = arith.constant dense<0xFF800000> : vector<16xf32>
    %206 = vector.multi_reduction <maximumf>, %205, %cst_65 [1] : vector<16x16xf32> to vector<16xf32>
    %207 = vector.shape_cast %206 : vector<16xf32> to vector<16x1xf32>
    %208 = vector.broadcast %207 : vector<16x1xf32> to vector<16x16xf32>
    %209 = arith.subf %205, %208 : vector<16x16xf32>
    %210 = math.exp %209 : vector<16x16xf32>
    %cst_66 = arith.constant dense<0.000000e+00> : vector<16xf32>
    %211 = vector.multi_reduction <add>, %210, %cst_66 [1] : vector<16x16xf32> to vector<16xf32>
    %212 = vector.shape_cast %211 : vector<16xf32> to vector<16x1xf32>
    %213 = tpu.reciprocal %212 {approx = true} : vector<16x1xf32> -> vector<16x1xf32>
    %214 = vector.broadcast %213 : vector<16x1xf32> to vector<16x16xf32>
    %215 = arith.mulf %210, %214 : vector<16x16xf32>
    %216 = arith.truncf %215 : vector<16x16xf32> to vector<16x16xbf16>
    %217 = arith.truncf %201 : vector<16x8xf32> to vector<16x8xbf16>
    %cst_67 = arith.constant dense<0.000000e+00> : vector<16x8xf32>
    %218 = tpu.matmul %216, %217, %cst_67 {dimension_numbers = #tpu.dot_dimension_numbers<[1], [0], [0], [1], [0, 0, 1, 1], [], []>} : vector<16x16xbf16>, vector<16x8xbf16>, vector<16x8xf32> -> vector<16x8xf32>
    %219 = vector.extract_strided_slice %198 {offsets = [0, 8], sizes = [16, 8], strides = [1, 1]} : vector<16x96xf32> to vector<16x8xf32>
    %220 = vector.extract_strided_slice %198 {offsets = [0, 40], sizes = [16, 8], strides = [1, 1]} : vector<16x96xf32> to vector<16x8xf32>
    %221 = vector.extract_strided_slice %198 {offsets = [0, 72], sizes = [16, 8], strides = [1, 1]} : vector<16x96xf32> to vector<16x8xf32>
    %222 = arith.truncf %219 : vector<16x8xf32> to vector<16x8xbf16>
    %223 = arith.truncf %220 : vector<16x8xf32> to vector<16x8xbf16>
    %cst_68 = arith.constant dense<0.000000e+00> : vector<16x16xf32>
    %224 = tpu.matmul %222, %223, %cst_68 {dimension_numbers = #tpu.dot_dimension_numbers<[1], [1], [0], [0], [0, 0, 1, 0], [], []>} : vector<16x8xbf16>, vector<16x8xbf16>, vector<16x16xf32> -> vector<16x16xf32>
    %225 = arith.addf %224, %1 : vector<16x16xf32>
    %cst_69 = arith.constant dense<0xFF800000> : vector<16xf32>
    %226 = vector.multi_reduction <maximumf>, %225, %cst_69 [1] : vector<16x16xf32> to vector<16xf32>
    %227 = vector.shape_cast %226 : vector<16xf32> to vector<16x1xf32>
    %228 = vector.broadcast %227 : vector<16x1xf32> to vector<16x16xf32>
    %229 = arith.subf %225, %228 : vector<16x16xf32>
    %230 = math.exp %229 : vector<16x16xf32>
    %cst_70 = arith.constant dense<0.000000e+00> : vector<16xf32>
    %231 = vector.multi_reduction <add>, %230, %cst_70 [1] : vector<16x16xf32> to vector<16xf32>
    %232 = vector.shape_cast %231 : vector<16xf32> to vector<16x1xf32>
    %233 = tpu.reciprocal %232 {approx = true} : vector<16x1xf32> -> vector<16x1xf32>
    %234 = vector.broadcast %233 : vector<16x1xf32> to vector<16x16xf32>
    %235 = arith.mulf %230, %234 : vector<16x16xf32>
    %236 = arith.truncf %235 : vector<16x16xf32> to vector<16x16xbf16>
    %237 = arith.truncf %221 : vector<16x8xf32> to vector<16x8xbf16>
    %cst_71 = arith.constant dense<0.000000e+00> : vector<16x8xf32>
    %238 = tpu.matmul %236, %237, %cst_71 {dimension_numbers = #tpu.dot_dimension_numbers<[1], [0], [0], [1], [0, 0, 1, 1], [], []>} : vector<16x16xbf16>, vector<16x8xbf16>, vector<16x8xf32> -> vector<16x8xf32>
    %239 = vector.extract_strided_slice %198 {offsets = [0, 16], sizes = [16, 8], strides = [1, 1]} : vector<16x96xf32> to vector<16x8xf32>
    %240 = vector.extract_strided_slice %198 {offsets = [0, 48], sizes = [16, 8], strides = [1, 1]} : vector<16x96xf32> to vector<16x8xf32>
    %241 = vector.extract_strided_slice %198 {offsets = [0, 80], sizes = [16, 8], strides = [1, 1]} : vector<16x96xf32> to vector<16x8xf32>
    %242 = arith.truncf %239 : vector<16x8xf32> to vector<16x8xbf16>
    %243 = arith.truncf %240 : vector<16x8xf32> to vector<16x8xbf16>
    %cst_72 = arith.constant dense<0.000000e+00> : vector<16x16xf32>
    %244 = tpu.matmul %242, %243, %cst_72 {dimension_numbers = #tpu.dot_dimension_numbers<[1], [1], [0], [0], [0, 0, 1, 0], [], []>} : vector<16x8xbf16>, vector<16x8xbf16>, vector<16x16xf32> -> vector<16x16xf32>
    %245 = arith.addf %244, %1 : vector<16x16xf32>
    %cst_73 = arith.constant dense<0xFF800000> : vector<16xf32>
    %246 = vector.multi_reduction <maximumf>, %245, %cst_73 [1] : vector<16x16xf32> to vector<16xf32>
    %247 = vector.shape_cast %246 : vector<16xf32> to vector<16x1xf32>
    %248 = vector.broadcast %247 : vector<16x1xf32> to vector<16x16xf32>
    %249 = arith.subf %245, %248 : vector<16x16xf32>
    %250 = math.exp %249 : vector<16x16xf32>
    %cst_74 = arith.constant dense<0.000000e+00> : vector<16xf32>
    %251 = vector.multi_reduction <add>, %250, %cst_74 [1] : vector<16x16xf32> to vector<16xf32>
    %252 = vector.shape_cast %251 : vector<16xf32> to vector<16x1xf32>
    %253 = tpu.reciprocal %252 {approx = true} : vector<16x1xf32> -> vector<16x1xf32>
    %254 = vector.broadcast %253 : vector<16x1xf32> to vector<16x16xf32>
    %255 = arith.mulf %250, %254 : vector<16x16xf32>
    %256 = arith.truncf %255 : vector<16x16xf32> to vector<16x16xbf16>
    %257 = arith.truncf %241 : vector<16x8xf32> to vector<16x8xbf16>
    %cst_75 = arith.constant dense<0.000000e+00> : vector<16x8xf32>
    %258 = tpu.matmul %256, %257, %cst_75 {dimension_numbers = #tpu.dot_dimension_numbers<[1], [0], [0], [1], [0, 0, 1, 1], [], []>} : vector<16x16xbf16>, vector<16x8xbf16>, vector<16x8xf32> -> vector<16x8xf32>
    %259 = vector.extract_strided_slice %198 {offsets = [0, 24], sizes = [16, 8], strides = [1, 1]} : vector<16x96xf32> to vector<16x8xf32>
    %260 = vector.extract_strided_slice %198 {offsets = [0, 56], sizes = [16, 8], strides = [1, 1]} : vector<16x96xf32> to vector<16x8xf32>
    %261 = vector.extract_strided_slice %198 {offsets = [0, 88], sizes = [16, 8], strides = [1, 1]} : vector<16x96xf32> to vector<16x8xf32>
    %262 = arith.truncf %259 : vector<16x8xf32> to vector<16x8xbf16>
    %263 = arith.truncf %260 : vector<16x8xf32> to vector<16x8xbf16>
    %cst_76 = arith.constant dense<0.000000e+00> : vector<16x16xf32>
    %264 = tpu.matmul %262, %263, %cst_76 {dimension_numbers = #tpu.dot_dimension_numbers<[1], [1], [0], [0], [0, 0, 1, 0], [], []>} : vector<16x8xbf16>, vector<16x8xbf16>, vector<16x16xf32> -> vector<16x16xf32>
    %265 = arith.addf %264, %1 : vector<16x16xf32>
    %cst_77 = arith.constant dense<0xFF800000> : vector<16xf32>
    %266 = vector.multi_reduction <maximumf>, %265, %cst_77 [1] : vector<16x16xf32> to vector<16xf32>
    %267 = vector.shape_cast %266 : vector<16xf32> to vector<16x1xf32>
    %268 = vector.broadcast %267 : vector<16x1xf32> to vector<16x16xf32>
    %269 = arith.subf %265, %268 : vector<16x16xf32>
    %270 = math.exp %269 : vector<16x16xf32>
    %cst_78 = arith.constant dense<0.000000e+00> : vector<16xf32>
    %271 = vector.multi_reduction <add>, %270, %cst_78 [1] : vector<16x16xf32> to vector<16xf32>
    %272 = vector.shape_cast %271 : vector<16xf32> to vector<16x1xf32>
    %273 = tpu.reciprocal %272 {approx = true} : vector<16x1xf32> -> vector<16x1xf32>
    %274 = vector.broadcast %273 : vector<16x1xf32> to vector<16x16xf32>
    %275 = arith.mulf %270, %274 : vector<16x16xf32>
    %276 = arith.truncf %275 : vector<16x16xf32> to vector<16x16xbf16>
    %277 = arith.truncf %261 : vector<16x8xf32> to vector<16x8xbf16>
    %cst_79 = arith.constant dense<0.000000e+00> : vector<16x8xf32>
    %278 = tpu.matmul %276, %277, %cst_79 {dimension_numbers = #tpu.dot_dimension_numbers<[1], [0], [0], [1], [0, 0, 1, 1], [], []>} : vector<16x16xbf16>, vector<16x8xbf16>, vector<16x8xf32> -> vector<16x8xf32>
    %279 = tpu.concatenate %218, %238, %258, %278 in 1 : vector<16x8xf32>, vector<16x8xf32>, vector<16x8xf32>, vector<16x8xf32> -> vector<16x32xf32>
    %280 = arith.truncf %279 : vector<16x32xf32> to vector<16x32xbf16>
    %281 = arith.truncf %169 : vector<32x32xf32> to vector<32x32xbf16>
    %cst_80 = arith.constant dense<0.000000e+00> : vector<16x32xf32>
    %282 = tpu.matmul %280, %281, %cst_80 {dimension_numbers = #tpu.dot_dimension_numbers<[1], [0], [0], [1], [0, 0, 1, 1], [], []>} : vector<16x32xbf16>, vector<32x32xbf16>, vector<16x32xf32> -> vector<16x32xf32>
    %283 = arith.addf %167, %282 : vector<16x32xf32>
    %284 = vector.broadcast %173 : vector<1x32xf32> to vector<16x32xf32>
    %285 = arith.addf %283, %284 : vector<16x32xf32>
    %cst_81 = arith.constant dense<0.000000e+00> : vector<16xf32>
    %286 = vector.multi_reduction <add>, %285, %cst_81 [1] : vector<16x32xf32> to vector<16xf32>
    %287 = vector.shape_cast %286 : vector<16xf32> to vector<16x1xf32>
    %cst_82 = arith.constant 3.200000e+01 : f32
    %288 = vector.broadcast %cst_82 : f32 to vector<16x1xf32>
    %289 = arith.divf %287, %288 : vector<16x1xf32>
    %290 = vector.broadcast %289 : vector<16x1xf32> to vector<16x32xf32>
    %291 = arith.subf %285, %290 : vector<16x32xf32>
    %292 = arith.mulf %291, %291 : vector<16x32xf32>
    %cst_83 = arith.constant dense<0.000000e+00> : vector<16xf32>
    %293 = vector.multi_reduction <add>, %292, %cst_83 [1] : vector<16x32xf32> to vector<16xf32>
    %294 = vector.shape_cast %293 : vector<16xf32> to vector<16x1xf32>
    %cst_84 = arith.constant 3.200000e+01 : f32
    %295 = vector.broadcast %cst_84 : f32 to vector<16x1xf32>
    %296 = arith.divf %294, %295 : vector<16x1xf32>
    %297 = vector.broadcast %289 : vector<16x1xf32> to vector<16x32xf32>
    %298 = arith.subf %285, %297 : vector<16x32xf32>
    %cst_85 = arith.constant 9.99999997E-7 : f32
    %299 = vector.broadcast %cst_85 : f32 to vector<16x1xf32>
    %300 = arith.addf %296, %299 : vector<16x1xf32>
    %301 = math.rsqrt %300 : vector<16x1xf32>
    %302 = vector.broadcast %301 : vector<16x1xf32> to vector<16x32xf32>
    %303 = arith.mulf %298, %302 : vector<16x32xf32>
    %304 = arith.truncf %303 : vector<16x32xf32> to vector<16x32xbf16>
    %305 = arith.truncf %170 : vector<32x128xf32> to vector<32x128xbf16>
    %cst_86 = arith.constant dense<0.000000e+00> : vector<16x128xf32>
    %306 = tpu.matmul %304, %305, %cst_86 {dimension_numbers = #tpu.dot_dimension_numbers<[1], [0], [0], [1], [0, 0, 1, 1], [], []>} : vector<16x32xbf16>, vector<32x128xbf16>, vector<16x128xf32> -> vector<16x128xf32>
    %307 = vector.broadcast %174 : vector<1x128xf32> to vector<16x128xf32>
    %308 = arith.addf %306, %307 : vector<16x128xf32>
    %309 = arith.mulf %308, %308 : vector<16x128xf32>
    %310 = arith.mulf %308, %309 : vector<16x128xf32>
    %cst_87 = arith.constant 4.471500e-02 : f32
    %311 = vector.broadcast %cst_87 : f32 to vector<16x128xf32>
    %312 = arith.mulf %311, %310 : vector<16x128xf32>
    %313 = arith.addf %308, %312 : vector<16x128xf32>
    %cst_88 = arith.constant 0.797884583 : f32
    %314 = vector.broadcast %cst_88 : f32 to vector<16x128xf32>
    %315 = arith.mulf %314, %313 : vector<16x128xf32>
    %316 = math.tanh %315 : vector<16x128xf32>
    %cst_89 = arith.constant 1.000000e+00 : f32
    %317 = vector.broadcast %cst_89 : f32 to vector<16x128xf32>
    %318 = arith.addf %317, %316 : vector<16x128xf32>
    %cst_90 = arith.constant 5.000000e-01 : f32
    %319 = vector.broadcast %cst_90 : f32 to vector<16x128xf32>
    %320 = arith.mulf %319, %318 : vector<16x128xf32>
    %321 = arith.mulf %308, %320 : vector<16x128xf32>
    %322 = arith.truncf %321 : vector<16x128xf32> to vector<16x128xbf16>
    %323 = arith.truncf %171 : vector<128x32xf32> to vector<128x32xbf16>
    %cst_91 = arith.constant dense<0.000000e+00> : vector<16x32xf32>
    %324 = tpu.matmul %322, %323, %cst_91 {dimension_numbers = #tpu.dot_dimension_numbers<[1], [0], [0], [1], [0, 0, 1, 1], [], []>} : vector<16x128xbf16>, vector<128x32xbf16>, vector<16x32xf32> -> vector<16x32xf32>
    %325 = arith.addf %285, %324 : vector<16x32xf32>
    %326 = vector.broadcast %175 : vector<1x32xf32> to vector<16x32xf32>
    %327 = arith.addf %325, %326 : vector<16x32xf32>
    %328 = vector.extract_strided_slice %327 {offsets = [0, 0], sizes = [1, 32], strides = [1, 1]} : vector<16x32xf32> to vector<1x32xf32>
    %329 = vector.extract_strided_slice %327 {offsets = [8, 0], sizes = [1, 32], strides = [1, 1]} : vector<16x32xf32> to vector<1x32xf32>
    %330 = tpu.concatenate %328, %329 in 0 : vector<1x32xf32>, vector<1x32xf32> -> vector<2x32xf32>
    %cst_92 = arith.constant dense<0.000000e+00> : vector<2xf32>
    %331 = vector.multi_reduction <add>, %330, %cst_92 [1] : vector<2x32xf32> to vector<2xf32>
    %332 = vector.shape_cast %331 : vector<2xf32> to vector<2x1xf32>
    %cst_93 = arith.constant 3.200000e+01 : f32
    %333 = vector.broadcast %cst_93 : f32 to vector<2x1xf32>
    %334 = arith.divf %332, %333 : vector<2x1xf32>
    %335 = vector.broadcast %334 : vector<2x1xf32> to vector<2x32xf32>
    %336 = arith.subf %330, %335 : vector<2x32xf32>
    %337 = arith.mulf %336, %336 : vector<2x32xf32>
    %cst_94 = arith.constant dense<0.000000e+00> : vector<2xf32>
    %338 = vector.multi_reduction <add>, %337, %cst_94 [1] : vector<2x32xf32> to vector<2xf32>
    %339 = vector.shape_cast %338 : vector<2xf32> to vector<2x1xf32>
    %cst_95 = arith.constant 3.200000e+01 : f32
    %340 = vector.broadcast %cst_95 : f32 to vector<2x1xf32>
    %341 = arith.divf %339, %340 : vector<2x1xf32>
    %342 = vector.broadcast %334 : vector<2x1xf32> to vector<2x32xf32>
    %343 = arith.subf %330, %342 : vector<2x32xf32>
    %cst_96 = arith.constant 9.99999997E-7 : f32
    %344 = vector.broadcast %cst_96 : f32 to vector<2x1xf32>
    %345 = arith.addf %341, %344 : vector<2x1xf32>
    %346 = math.rsqrt %345 : vector<2x1xf32>
    %347 = vector.broadcast %346 : vector<2x1xf32> to vector<2x32xf32>
    %348 = arith.mulf %343, %347 : vector<2x32xf32>
    %c0_97 = arith.constant 0 : index
    %c512 = arith.constant 512 : index
    %349 = vector.load %arg2[%c0_97, %c512] : memref<32x608xf32, #tpu.memory_space<vmem>>, vector<32x32xf32>
    %c0_98 = arith.constant 0 : index
    %c544 = arith.constant 544 : index
    %350 = vector.load %arg2[%c0_98, %c544] : memref<32x608xf32, #tpu.memory_space<vmem>>, vector<32x64xf32>
    %c8 = arith.constant 8 : index
    %c0_99 = arith.constant 0 : index
    %351 = vector.load %arg3[%c8, %c0_99] : memref<16x176xf32, #tpu.memory_space<vmem>>, vector<1x32xf32>
    %c9 = arith.constant 9 : index
    %c0_100 = arith.constant 0 : index
    %352 = vector.load %arg3[%c9, %c0_100] : memref<16x176xf32, #tpu.memory_space<vmem>>, vector<1x64xf32>
    %353 = arith.truncf %348 : vector<2x32xf32> to vector<2x32xbf16>
    %354 = arith.truncf %349 : vector<32x32xf32> to vector<32x32xbf16>
    %cst_101 = arith.constant dense<0.000000e+00> : vector<2x32xf32>
    %355 = tpu.matmul %353, %354, %cst_101 {dimension_numbers = #tpu.dot_dimension_numbers<[1], [0], [0], [1], [0, 0, 1, 1], [], []>} : vector<2x32xbf16>, vector<32x32xbf16>, vector<2x32xf32> -> vector<2x32xf32>
    %356 = vector.broadcast %351 : vector<1x32xf32> to vector<2x32xf32>
    %357 = arith.addf %355, %356 : vector<2x32xf32>
    %cst_102 = arith.constant 0.000000e+00 : f32
    %358 = vector.broadcast %cst_102 : f32 to vector<2x32xf32>
    %359 = arith.maximumf %357, %358 : vector<2x32xf32>
    %360 = arith.truncf %359 : vector<2x32xf32> to vector<2x32xbf16>
    %361 = arith.truncf %350 : vector<32x64xf32> to vector<32x64xbf16>
    %cst_103 = arith.constant dense<0.000000e+00> : vector<2x64xf32>
    %362 = tpu.matmul %360, %361, %cst_103 {dimension_numbers = #tpu.dot_dimension_numbers<[1], [0], [0], [1], [0, 0, 1, 1], [], []>} : vector<2x32xbf16>, vector<32x64xbf16>, vector<2x64xf32> -> vector<2x64xf32>
    %363 = vector.broadcast %352 : vector<1x64xf32> to vector<2x64xf32>
    %364 = arith.addf %362, %363 : vector<2x64xf32>
    %365 = arith.mulf %364, %364 : vector<2x64xf32>
    %cst_104 = arith.constant dense<0.000000e+00> : vector<2xf32>
    %366 = vector.multi_reduction <add>, %365, %cst_104 [1] : vector<2x64xf32> to vector<2xf32>
    %367 = vector.shape_cast %366 : vector<2xf32> to vector<2x1xf32>
    %368 = math.sqrt %367 : vector<2x1xf32>
    %cst_105 = arith.constant 9.99999996E-13 : f32
    %369 = vector.broadcast %cst_105 : f32 to vector<2x1xf32>
    %370 = arith.maximumf %368, %369 : vector<2x1xf32>
    %371 = vector.broadcast %370 : vector<2x1xf32> to vector<2x64xf32>
    %372 = arith.divf %364, %371 : vector<2x64xf32>
    %c0_106 = arith.constant 0 : index
    %c0_107 = arith.constant 0 : index
    %373 = vector.load %arg4[%c0_106, %c0_107] : memref<2x64xf32, #tpu.memory_space<vmem>>, vector<2x64xf32>
    tpu.vector_store %arg4[%c0_106, %c0_107], %372 {strides = array<i32>} : memref<2x64xf32, #tpu.memory_space<vmem>>, vector<2x64xf32>,
    return
  }
}

</mosaic_0001>

<bundles_post_ra>
// kernel: _forward.1
= control target key start
LH: loop header
LB: loop body
LE: loop exit
PB: predicated region body
PF: predicated region fallthrough
CT: control target
= control target key end

     0   :  { %s3562_s0 = inlined_call_operand.vmem [shape: f32[16,768], index: 0, kind: input, shape index: {}]   ;;  %s3563_s1 = inlined_call_operand.vmem [shape: f32[1024,32], index: 1, kind: input, shape index: {}]   ;;  %s3564_s2 = inlined_call_operand.vmem [shape: f32[32,608], index: 2, kind: input, shape index: {}]   ;;  %s3565_s3 = inlined_call_operand.vmem [shape: f32[16,176], index: 3, kind: input, shape index: {}]   ;;  %s3566_s4 = inlined_call_operand.hbm [shape: f32[2,64], index: 4, kind: output, shape index: {}]  }
   0x1   :  { %v49_v0 = vld [vmem:[%s3563_s1 + $0x80] sm:$0xff]  ;;  %v50_v1 = vld [vmem:[%s3563_s1 + $0x88] sm:$0xff]  ;;  %v51_v11 = vld [vmem:[%s3563_s1 + $0x90] sm:$0xff] }
   0x2   :  { %v33_v2 = vld [vmem:[%s3563_s1] sm:$0xff]  ;;  %v143_v3 = vpack.c.bf16 %v50_v1, %v49_v0  ;;  %v34_v4 = vld [vmem:[%s3563_s1 + $0x8] sm:$0xff]  ;;  %v52_v13 = vld [vmem:[%s3563_s1 + $0x98] sm:$0xff] }
   0x3   :  { %v81_v5 = vld [vmem:[%s3563_s1 + $0x180] sm:$0xff]  ;;  %v82_v6 = vld [vmem:[%s3563_s1 + $0x188] sm:$0xff]  ;;  %v135_v7 = vpack.c.bf16 %v34_v4, %v33_v2  ;;  %v35_v14 = vld [vmem:[%s3563_s1 + $0x10] sm:$0xff]  ;;  %v144_v16 = vpack.c.bf16 %v52_v13, %v51_v11 }
   0x4   :  { %v159_v8 = vpack.c.bf16 %v82_v6, %v81_v5  ;;  %v65_v9 = vld [vmem:[%s3563_s1 + $0x100] sm:$0xff]  ;;  %v66_v10 = vld [vmem:[%s3563_s1 + $0x108] sm:$0xff]  ;;  %2131 = vmatprep.subr.bf16.mxu0 %v143_v3  ;;  %v36_v15 = vld [vmem:[%s3563_s1 + $0x18] sm:$0xff] }
   0x5   :  { %v151_v12 = vpack.c.bf16 %v66_v10, %v65_v9  ;;  %2132 = vmatpush3.bf16.msra.mxu0 %v135_v7  ;;  %v136_v17 = vpack.c.bf16 %v36_v15, %v35_v14  ;;  %v83_v18 = vld [vmem:[%s3563_s1 + $0x190] sm:$0xff]  ;;  %v84_v19 = vld [vmem:[%s3563_s1 + $0x198] sm:$0xff]  ;;  %v53_v23 = vld [vmem:[%s3563_s1 + $0xa0] sm:$0xff] }
   0x6   :  { %2153 = vmatprep.subr.bf16.mxu1 %v159_v8  ;;  %v67_v20 = vld [vmem:[%s3563_s1 + $0x110] sm:$0xff]  ;;  %v160_v21 = vpack.c.bf16 %v84_v19, %v83_v18  ;;  %v68_v22 = vld [vmem:[%s3563_s1 + $0x118] sm:$0xff]  ;;  %v54_v24 = vld [vmem:[%s3563_s1 + $0xa8] sm:$0xff]  ;;  %2133 = vmatprep.subr.bf16.mxu0 %v144_v16 }
   0x7   :  { %2154 = vmatpush3.bf16.msra.mxu1 %v151_v12  ;;  %v152_v25 = vpack.c.bf16 %v68_v22, %v67_v20  ;;  %v145_v26 = vpack.c.bf16 %v54_v24, %v53_v23  ;;  %v37_v27 = vld [vmem:[%s3563_s1 + $0x20] sm:$0xff]  ;;  %v38_v28 = vld [vmem:[%s3563_s1 + $0x28] sm:$0xff]  ;;  %v55_v35 = vld [vmem:[%s3563_s1 + $0xb0] sm:$0xff] }
   0x8   :  { %v85_v29 = vld [vmem:[%s3563_s1 + $0x1a0] sm:$0xff]  ;;  %2155 = vmatprep.subr.bf16.mxu1 %v160_v21  ;;  %v86_v30 = vld [vmem:[%s3563_s1 + $0x1a8] sm:$0xff]  ;;  %v137_v33 = vpack.c.bf16 %v38_v28, %v37_v27  ;;  %v56_v36 = vld [vmem:[%s3563_s1 + $0xb8] sm:$0xff] }
   0x9   :  { %v69_v31 = vld [vmem:[%s3563_s1 + $0x120] sm:$0xff]  ;;  %v70_v32 = vld [vmem:[%s3563_s1 + $0x128] sm:$0xff]  ;;  %2134 = vmatpush3.bf16.msra.mxu0 %v136_v17  ;;  %v161_v34 = vpack.c.bf16 %v86_v30, %v85_v29  ;;  %v39_v37 = vld [vmem:[%s3563_s1 + $0x30] sm:$0xff]  ;;  %v146_v39 = vpack.c.bf16 %v56_v36, %v55_v35 }
   0xa   :  { %2135 = vmatprep.subr.bf16.mxu0 %v145_v26  ;;  %v153_v38 = vpack.c.bf16 %v70_v32, %v69_v31  ;;  %v40_v40 = vld [vmem:[%s3563_s1 + $0x38] sm:$0xff]  ;;  %v87_v41 = vld [vmem:[%s3563_s1 + $0x1b0] sm:$0xff]  ;;  %v57_v46 = vld [vmem:[%s3563_s1 + $0xc0] sm:$0xff] }
   0xb   :  { %2156 = vmatpush3.bf16.msra.mxu1 %v152_v25  ;;  %v88_v42 = vld [vmem:[%s3563_s1 + $0x1b8] sm:$0xff]  ;;  %v71_v44 = vld [vmem:[%s3563_s1 + $0x130] sm:$0xff]  ;;  %v58_v47 = vld [vmem:[%s3563_s1 + $0xc8] sm:$0xff]  ;;  %v138_v48 = vpack.c.bf16 %v40_v40, %v39_v37 }
   0xc   :  { %2157 = vmatprep.subr.bf16.mxu1 %v161_v34  ;;  %v162_v43 = vpack.c.bf16 %v88_v42, %v87_v41  ;;  %v72_v45 = vld [vmem:[%s3563_s1 + $0x138] sm:$0xff]  ;;  %v89_v49 = vld [vmem:[%s3563_s1 + $0x1c0] sm:$0xff]  ;;  %v90_v50 = vld [vmem:[%s3563_s1 + $0x1c8] sm:$0xff]  ;;  %v147_v52 = vpack.c.bf16 %v58_v47, %v57_v46 }
   0xd   :  { %2136 = vmatpush3.bf16.msra.mxu0 %v137_v33  ;;  %v154_v51 = vpack.c.bf16 %v72_v45, %v71_v44  ;;  %v41_v53 = vld [vmem:[%s3563_s1 + $0x40] sm:$0xff]  ;;  %v42_v54 = vld [vmem:[%s3563_s1 + $0x48] sm:$0xff]  ;;  %v163_v56 = vpack.c.bf16 %v90_v50, %v89_v49  ;;  %v59_v58 = vld [vmem:[%s3563_s1 + $0xd0] sm:$0xff] }
   0xe   :  { %2137 = vmatprep.subr.bf16.mxu0 %v146_v39  ;;  %v73_v55 = vld [vmem:[%s3563_s1 + $0x140] sm:$0xff]  ;;  %v74_v57 = vld [vmem:[%s3563_s1 + $0x148] sm:$0xff]  ;;  %v60_v59 = vld [vmem:[%s3563_s1 + $0xd8] sm:$0xff]  ;;  %v139_v62 = vpack.c.bf16 %v42_v54, %v41_v53 }
   0xf   :  { %2158 = vmatpush3.bf16.msra.mxu1 %v153_v38  ;;  %v91_v60 = vld [vmem:[%s3563_s1 + $0x1d0] sm:$0xff]  ;;  %v92_v61 = vld [vmem:[%s3563_s1 + $0x1d8] sm:$0xff]  ;;  %v155_v63 = vpack.c.bf16 %v74_v57, %v73_v55  ;;  %v148_v0 = vpack.c.bf16 %v60_v59, %v59_v58  ;;  %v61_v6 = vld [vmem:[%s3563_s1 + $0xe0] sm:$0xff] }
  0x10   :  { %2159 = vmatprep.subr.bf16.mxu1 %v162_v43  ;;  %v43_v1 = vld [vmem:[%s3563_s1 + $0x50] sm:$0xff]  ;;  %v44_v2 = vld [vmem:[%s3563_s1 + $0x58] sm:$0xff]  ;;  %v164_v4 = vpack.c.bf16 %v92_v61, %v91_v60  ;;  %v62_v7 = vld [vmem:[%s3563_s1 + $0xe8] sm:$0xff] }
  0x11   :  { %2138 = vmatpush3.bf16.msra.mxu0 %v138_v48  ;;  %v75_v3 = vld [vmem:[%s3563_s1 + $0x150] sm:$0xff]  ;;  %v76_v5 = vld [vmem:[%s3563_s1 + $0x158] sm:$0xff]  ;;  %v93_v8 = vld [vmem:[%s3563_s1 + $0x1e0] sm:$0xff]  ;;  %v140_v10 = vpack.c.bf16 %v44_v2, %v43_v1  ;;  %v149_v15 = vpack.c.bf16 %v62_v7, %v61_v6 }
  0x12   :  { %2139 = vmatprep.subr.bf16.mxu0 %v147_v52  ;;  %v94_v9 = vld [vmem:[%s3563_s1 + $0x1e8] sm:$0xff]  ;;  %v45_v11 = vld [vmem:[%s3563_s1 + $0x60] sm:$0xff]  ;;  %v156_v14 = vpack.c.bf16 %v76_v5, %v75_v3  ;;  %v28_v18 = vld [vmem:[%s3562_s0 + $0x38] sm:$0xff] }
  0x13   :  { %2160 = vmatpush3.bf16.msra.mxu1 %v154_v51  ;;  %v46_v12 = vld [vmem:[%s3563_s1 + $0x68] sm:$0xff]  ;;  %v77_v16 = vld [vmem:[%s3563_s1 + $0x160] sm:$0xff]  ;;  %v165_v19 = vpack.c.bf16 %v94_v9, %v93_v8  ;;  %v63_v20 = vld [vmem:[%s3563_s1 + $0xf0] sm:$0xff] }
  0x14   :  { %2161 = vmatprep.subr.bf16.mxu1 %v163_v56  ;;  %v22_v13 = vld [vmem:[%s3562_s0 + $0x8] sm:$0xff]  ;;  %v64_v21 = vld [vmem:[%s3563_s1 + $0xf8] sm:$0xff]  ;;  %v95_v22 = vld [vmem:[%s3563_s1 + $0x1f0] sm:$0xff]  ;;  %v141_v27 = vpack.c.bf16 %v46_v12, %v45_v11 }
  0x15   :  { %2140 = vmatpush3.bf16.msra.mxu0 %v139_v62  ;;  %v78_v17 = vld [vmem:[%s3563_s1 + $0x168] sm:$0xff]  ;;  %v130_v23 = vpack.c.bf16 %v28_v18, %v22_v13  ;;  %v96_v24 = vld [vmem:[%s3563_s1 + $0x1f8] sm:$0xff]  ;;  %v150_v30 = vpack.c.bf16 %v64_v21, %v63_v20  ;;  %v47_v31 = vld [vmem:[%s3563_s1 + $0x70] sm:$0xff] }
  0x16   :  { %2141 = vmatprep.subr.bf16.mxu0 %v148_v0  ;;  %v24_v25 = vld [vmem:[%s3562_s0 + $0x18] sm:$0xff]  ;;  %v30_v26 = vld [vmem:[%s3562_s0 + $0x48] sm:$0xff]  ;;  %v157_v29 = vpack.c.bf16 %v78_v17, %v77_v16  ;;  %v79_v33 = vld [vmem:[%s3563_s1 + $0x170] sm:$0xff]  ;;  %v166_v34 = vpack.c.bf16 %v96_v24, %v95_v22 }
  0x17   :  { %2162 = vmatpush3.bf16.msra.mxu1 %v155_v63  ;;  %215 = vmatprep.mubr.bf16.mxu0 %v130_v23  ;;  %v132_v28 = vpack.c.bf16 %v30_v26, %v24_v25  ;;  %v48_v32 = vld [vmem:[%s3563_s1 + $0x78] sm:$0xff]  ;;  %v113_v36 = vld [vmem:[%s3563_s1 + $0x280] sm:$0xff]  ;;  %v114_v37 = vld [vmem:[%s3563_s1 + $0x288] sm:$0xff] }
  0x18   :  { %2163 = vmatprep.subr.bf16.mxu1 %v164_v4  ;;  %v80_v35 = vld [vmem:[%s3563_s1 + $0x178] sm:$0xff]  ;;  %v142_v38 = vpack.c.bf16 %v48_v32, %v47_v31  ;;  %v21_v39 = vld [vmem:[%s3562_s0] sm:$0xff]  ;;  %v27_v40 = vld [vmem:[%s3562_s0 + $0x30] sm:$0xff]  ;;  %v175_v43 = vpack.c.bf16 %v114_v37, %v113_v36 }
  0x19   :  { %2142 = vmatpush3.bf16.msra.mxu0 %v140_v10  ;;  %256 = vmatprep.mubr.bf16.mxu1 %v132_v28  ;;  %v97_v41 = vld [vmem:[%s3563_s1 + $0x200] sm:$0xff]  ;;  %v158_v42 = vpack.c.bf16 %v80_v35, %v79_v33  ;;  %v98_v44 = vld [vmem:[%s3563_s1 + $0x208] sm:$0xff]  ;;  %v23_v45 = vld [vmem:[%s3562_s0 + $0x10] sm:$0xff]  ;;  %v129_v49 = vpack.c.bf16 %v27_v40, %v21_v39 }
  0x1a   :  { %2143 = vmatprep.subr.bf16.mxu0 %v149_v15  ;;  %v29_v46 = vld [vmem:[%s3562_s0 + $0x40] sm:$0xff]  ;;  %v115_v47 = vld [vmem:[%s3563_s1 + $0x290] sm:$0xff]  ;;  %v116_v48 = vld [vmem:[%s3563_s1 + $0x298] sm:$0xff]  ;;  %v167_v50 = vpack.c.bf16 %v98_v44, %v97_v41 }
  0x1b   :  { %2164 = vmatpush3.bf16.msra.mxu1 %v156_v14  ;;  %v131_v51 = vpack.c.bf16 %v29_v46, %v23_v45  ;;  %v176_v52 = vpack.c.bf16 %v116_v48, %v115_v47  ;;  %v99_v53 = vld [vmem:[%s3563_s1 + $0x210] sm:$0xff]  ;;  %v100_v54 = vld [vmem:[%s3563_s1 + $0x218] sm:$0xff]  ;;  %v117_v55 = vld [vmem:[%s3563_s1 + $0x2a0] sm:$0xff] }
  0x1c   :  { %2165 = vmatprep.subr.bf16.mxu1 %v165_v19  ;;  %v118_v56 = vld [vmem:[%s3563_s1 + $0x2a8] sm:$0xff]  ;;  %v32_v58 = vld [vmem:[%s3562_s0 + $0x58] sm:$0xff]  ;;  %v168_v59 = vpack.c.bf16 %v100_v54, %v99_v53 }
  0x1d   :  { %2144 = vmatpush3.bf16.msra.mxu0 %v141_v27  ;;  %v26_v57 = vld [vmem:[%s3562_s0 + $0x28] sm:$0xff] }
  0x1e   :  { %2145 = vmatprep.subr.bf16.mxu0 %v150_v30  ;;  %v134_v60 = vpack.c.bf16 %v32_v58, %v26_v57 }
  0x1f   :  { %2166 = vmatpush3.bf16.msra.mxu1 %v157_v29 }
  0x20   :  { %2167 = vmatprep.subr.bf16.mxu1 %v166_v34 }
  0x21   :  { %2146 = vmatpush3.bf16.msra.mxu0 %v142_v38 }
  0x22   :  { %2175 = vmatprep.subr.bf16.mxu0 %v175_v43 }
  0x23   :  { %2168 = vmatpush3.bf16.msra.mxu1 %v158_v42 }
  0x24   :  { %216 = vmatmul.mubr.bf16.vlgmr.msra.gmra.mrb[0].mxu0 %v129_v49 }
  0x25   :  { %2176 = vmatpush3.bf16.msra.mxu0 %v167_v50 }
  0x26   :  { %257 = vmatmul.mubr.bf16.vlgmr.msra.gmra.mrb[0].mxu1 %v131_v51 }
  0x27   :  { %9 = vsyncpa [#allocation3], 0  ;;  %2177 = vmatprep.subr.bf16.mxu0 %v176_v52  ;;  %v177_v61 = vpack.c.bf16 %v118_v56, %v117_v55  ;;  %v101_v62 = vld [vmem:[%s3563_s1 + $0x220] sm:$0xff]  ;;  %v102_v63 = vld [vmem:[%s3563_s1 + $0x228] sm:$0xff]  ;;  %297 = vmatprep.mubr.bf16.mxu0 %v134_v60  ;;  %vm334_vm0 = vcmask 261120   ;;  %vm2638_vm1 = vmmov 0  }
  0x28   :  { %v119_v0 = vld [vmem:[%s3563_s1 + $0x2b0] sm:$0xff]  ;;  %v120_v1 = vld [vmem:[%s3563_s1 + $0x2b8] sm:$0xff]  ;;  %v169_v2 = vpack.c.bf16 %v102_v63, %v101_v62  ;;  %v121_v6 = vld [vmem:[%s3563_s1 + $0x2c0] sm:$0xff]  ;;  %s2639_s8 = smov 96   ;;  %vm421_vm2 = vcmask 64512   ;;  %vm469_vm3 = vcmask 130048  }
  0x29   :  { %2178 = vmatpush3.bf16.msra.mxu0 %v168_v59  ;;  %v178_v3 = vpack.c.bf16 %v120_v1, %v119_v0  ;;  %v103_v4 = vld [vmem:[%s3563_s1 + $0x230] sm:$0xff]  ;;  %v104_v5 = vld [vmem:[%s3563_s1 + $0x238] sm:$0xff]  ;;  %v122_v7 = vld [vmem:[%s3563_s1 + $0x2c8] sm:$0xff]  ;;  %s2640_s11 = smov 64   ;;  %s2641_s12 = smov 120   ;;  %vm931_vm4 = vcmask 195584  }
  0x2a   :  { %2179 = vmatprep.subr.bf16.mxu0 %v177_v61  ;;  %v170_v8 = vpack.c.bf16 %v104_v5, %v103_v4  ;;  %v179_v9 = vpack.c.bf16 %v122_v7, %v121_v6  ;;  %v105_v10 = vld [vmem:[%s3563_s1 + $0x240] sm:$0xff]  ;;  %v106_v11 = vld [vmem:[%s3563_s1 + $0x248] sm:$0xff]  ;;  %v123_v12 = vld [vmem:[%s3563_s1 + $0x2d0] sm:$0xff]  ;;  %s2642_s13 = smov 88   ;;  %s2643_s14 = smov 80   ;;  %vm1956_vm5 = vcmask 1040384  }
  0x2b   :  { %v124_v13 = vld [vmem:[%s3563_s1 + $0x2d8] sm:$0xff]  ;;  %v171_v14 = vpack.c.bf16 %v106_v11, %v105_v10  ;;  %v107_v16 = vld [vmem:[%s3563_s1 + $0x250] sm:$0xff]  ;;  %v125_v18 = vld [vmem:[%s3563_s1 + $0x2e0] sm:$0xff]  ;;  %v2637_v11 = vmov 0.0   ;;  %s2644_s15 = smov 112   ;;  %s2645_s16 = smov 56  }
  0x2c   :  { %v180_v15 = vpack.c.bf16 %v124_v13, %v123_v12  ;;  %v108_v17 = vld [vmem:[%s3563_s1 + $0x258] sm:$0xff]  ;;  %v126_v19 = vld [vmem:[%s3563_s1 + $0x2e8] sm:$0xff]  ;;  %v109_v22 = vld [vmem:[%s3563_s1 + $0x260] sm:$0xff]  ;;  %2271 = vmatprep.subr.bf16.mxu1 %v2637_v11  ;;  %2275 = vmatprep.mubr.msk.bf16.mxu1 %vm2638_vm1, %v2637_v11  ;;  %s2646_s17 = smov 72   ;;  %s2647_s18 = smov 104   ;;  %vm1958_vm6 = vcmask 254976  }
  0x2d   :  { %2180 = vmatpush3.bf16.msra.mxu0 %v169_v2  ;;  %v172_v20 = vpack.c.bf16 %v108_v17, %v107_v16  ;;  %v181_v21 = vpack.c.bf16 %v126_v19, %v125_v18  ;;  %v110_v23 = vld [vmem:[%s3563_s1 + $0x268] sm:$0xff]  ;;  %v127_v24 = vld [vmem:[%s3563_s1 + $0x2f0] sm:$0xff]  ;;  %v128_v25 = vld [vmem:[%s3563_s1 + $0x2f8] sm:$0xff]  ;;  %s2648_s19 = smov 48   ;;  %s2649_s20 = smov 32   ;;  %vm2078_vm7 = vcmask 517120  }
  0x2e   :  { %2181 = vmatprep.subr.bf16.mxu0 %v178_v3  ;;  %v173_v26 = vpack.c.bf16 %v110_v23, %v109_v22  ;;  %v182_v27 = vpack.c.bf16 %v128_v25, %v127_v24  ;;  %v111_v28 = vld [vmem:[%s3563_s1 + $0x270] sm:$0xff]  ;;  %v112_v29 = vld [vmem:[%s3563_s1 + $0x278] sm:$0xff]  ;;  %v25_v31 = vld [vmem:[%s3562_s0 + $0x20] sm:$0xff]  ;;  %s2650_s21 = smov 8   ;;  %s2651_s22 = smov 40  }
  0x2f   :  { %v174_v30 = vpack.c.bf16 %v112_v29, %v111_v28  ;;  %v31_v32 = vld [vmem:[%s3562_s0 + $0x50] sm:$0xff]  ;;  %v3007_v35 = vld [vmem:[%s3565_s3 + $0x8] sm:$0xff]  ;;  %v3012_v41 = vld [vmem:[%s3565_s3 + $0x18] sm:$0xff]  ;;  %s2652_s23 = smov 16   ;;  %s2653_s24 = smov 24  }
  0x30   :  { %v133_v33 = vpack.c.bf16 %v31_v32, %v25_v31  ;;  %v308_v12 = vld [vmem:[%s3564_s2 + $0x50] sm:$0xff]  ;;  %v309_v13 = vld [vmem:[%s3564_s2 + $0x78] sm:$0xff] }
  0x31   :  { %2182 = vmatpush3.bf16.msra.mxu0 %v170_v8  ;;  %v306_v8 = vld [vmem:[%s3564_s2] sm:$0xff] }
  0x32   :  { %2183 = vmatprep.subr.bf16.mxu0 %v179_v9  ;;  %v307_v9 = vld [vmem:[%s3564_s2 + $0x28] sm:$0xff] }
  0x33   :  { %v3034_v10 = vpack.c.bf16 %v307_v9, %v306_v8 }
  0x35   :  { %2184 = vmatpush3.bf16.msra.mxu0 %v171_v14  ;;  %2272 = vmatpush3.bf16.msra.mxu1 %v3034_v10  ;;  %v3046_v14 = vpack.c.bf16 %v309_v13, %v308_v12 }
  0x36   :  { %2185 = vmatprep.subr.bf16.mxu0 %v180_v15  ;;  %2273 = vmatprep.subr.bf16.mxu1 %v2637_v11 }
  0x39   :  { %2186 = vmatpush3.bf16.msra.mxu0 %v172_v20  ;;  %2274 = vmatpush3.bf16.msra.mxu1 %v3046_v14 }
  0x3a   :  { %2187 = vmatprep.subr.bf16.mxu0 %v181_v21  ;;  %2279 = vmatprep.subr.bf16.mxu1 %v2637_v11 }
  0x3d   :  { %2188 = vmatpush3.bf16.msra.mxu0 %v173_v26  ;;  %v330_v26 = vld [vmem:[%s3565_s3] ss:$0 sm:$0xff] }
  0x3e   :  { %2189 = vmatprep.subr.bf16.mxu0 %v182_v27 }
  0x41   :  { %2190 = vmatpush3.bf16.msra.mxu0 %v174_v30 }
  0x42   :  { %2309 = vmatprep.subr.bf16.mxu0 %v2637_v11 }
  0x44   :  { %298 = vmatmul.mubr.bf16.vlgmr.msra.gmra.mrb[4].mxu0 %v133_v33 }
  0x45   :  { %2311 = vmatprep.mubr.msk.bf16.mxu0 %vm2638_vm1, %v2637_v11 }
  0xf7   :  { %v2147_v34 = vpop.f32.mrb[0].mxu0 }
  0xf8   :  { %v2148_v36 = vpop.f32.mrb[1].mxu0 }
  0xf9   :  { %v2169_v37 = vpop.f32.mrb[0].mxu1  ;;  %v2149_v38 = vadd.f32 %v2148_v36, %v2147_v34  ;;  %v2150_v39 = vpop.f32.mrb[2].mxu0 }
  0xfa   :  { %v2170_v40 = vpop.f32.mrb[1].mxu1  ;;  %v2151_v42 = vpop.f32.mrb[3].mxu0 }
  0xfb   :  { %v2171_v43 = vadd.f32 %v2170_v40, %v2169_v37  ;;  %v2172_v44 = vpop.f32.mrb[2].mxu1  ;;  %v218_v45 = vadd.f32 %v2149_v38, %v3007_v35  ;;  %v2152_v46 = vadd.f32 %v2151_v42, %v2150_v39 }
  0xfc   :  { %v2173_v47 = vpop.f32.mrb[3].mxu1 }
  0xfd   :  { %v2174_v48 = vadd.f32 %v2173_v47, %v2172_v44  ;;  %v221_v49 = vadd.f32 %v2152_v46, %v3012_v41  ;;  %v259_v50 = vadd.f32 %v2171_v43, %v218_v45 }
  0xff   :  { %v262_v51 = vadd.f32 %v2174_v48, %v221_v49 }
 0x117   :  { %v2191_v52 = vpop.f32.mrb[4].mxu0 }
 0x118   :  { %v2192_v53 = vpop.f32.mrb[5].mxu0 }
 0x119   :  { %v2193_v54 = vadd.f32 %v2192_v53, %v2191_v52  ;;  %v2194_v55 = vpop.f32.mrb[6].mxu0 }
 0x11a   :  { %v2195_v56 = vpop.f32.mrb[7].mxu0 }
 0x11b   :  { %v3016_v57 = vadd.f32 %v2193_v54, %v259_v50  ;;  %v2196_v58 = vadd.f32 %v2195_v56, %v2194_v55 }
 0x11d   :  { %v3018_v59 = vadd.f32 %v2196_v58, %v262_v51  ;;  %v335_v60 = vsel %vm334_vm0, %v3016_v57, 0.0 }
 0x11e   :  { %336 = vadd.xlane.f32.xlu0 %v335_v60 }
 0x11f   :  { %v338_v61 = vsel %vm334_vm0, %v3018_v59, 0.0 }
 0x122   :  { %339 = vadd.xlane.f32.xlu0 %v338_v61 }
 0x1ab   :  { %v337_v62 = vpop.xlane.xlu0 %336 }
 0x1ac   :  { %v342_v63 = vmul.f32 0.03125, %v337_v62 }
 0x1ae   :  { %v344_v0 = vsub.f32 %v3016_v57, %v342_v63 }
 0x1af   :  { %v340_v1 = vpop.xlane.xlu0 %339 }
 0x1b0   :  { %v343_v2 = vmul.f32 0.03125, %v340_v1  ;;  %v346_v3 = vmul.f32 %v344_v0, %v344_v0 }
 0x1b2   :  { %v345_v4 = vsub.f32 %v3018_v59, %v343_v2  ;;  %v348_v5 = vsel %vm334_vm0, %v346_v3, 0.0 }
 0x1b3   :  { %349 = vadd.xlane.f32.xlu1 %v348_v5 }
 0x1b4   :  { %v347_v6 = vmul.f32 %v345_v4, %v345_v4 }
 0x1b6   :  { %v351_v7 = vsel %vm334_vm0, %v347_v6, 0.0 }
 0x1b7   :  { %352 = vadd.xlane.f32.xlu1 %v351_v7 }
 0x1c8   :  { %415 = vrot.lane.b32.xlu1 %v3007_v35, %s2639_s8 }
 0x1cc   :  { %417 = vrot.lane.b32.xlu1 %v3012_v41, %s2639_s8 }
 0x240   :  { %v350_v15 = vpop.xlane.xlu1 %349 }
 0x241   :  { %v354_v16 = vmul.f32 0.03125, %v350_v15 }
 0x243   :  { %v356_v17 = vadd.f32 1e-06, %v354_v16 }
 0x244   :  { %v353_v18 = vpop.xlane.xlu1 %352 }
 0x245   :  { %v355_v19 = vmul.f32 0.03125, %v353_v18  ;;  %2519 = vrsqrt.f32 %v356_v17 }
 0x247   :  { %v357_v20 = vadd.f32 1e-06, %v355_v19 }
 0x248   :  { %v3074_v36 = vpop.permute.xlu1 %415 }
 0x249   :  { %2521 = vrsqrt.f32 %v357_v20 }
 0x24c   :  { %v3076_v38 = vpop.permute.xlu1 %417 }
 0x24f   :  { %v2520_v21 = vpop.eup %2519 }
 0x250   :  { %v360_v23 = vmul.f32 %v2520_v21, %v344_v0 }
 0x253   :  { %v2522_v22 = vpop.eup %2521 }
 0x254   :  { %v361_v24 = vmul.f32 %v2522_v22, %v345_v4 }
 0x256   :  { %v362_v25 = vpack.c.bf16 %v361_v24, %v360_v23 }
 0x258   :  { %2276 = vmatmul.mubr.msk.bf16.vlgmr.msra.gmra.mrb[4].mxu1 %vm334_vm0, %v362_v25 }
 0x259   :  { %2281 = vmatprep.mubr.msk.bf16.mxu1 %vm2638_vm1, %v2637_v11 }
 0x32b   :  { %v402_v27 = vpop.f32.mrb[4].mxu1 }
 0x32c   :  { %v2277_v28 = vpop.f32.mrb[5].mxu1  ;;  %v403_v30 = vadd.f32 %v402_v27, %v330_v26 }
 0x32d   :  { %v405_v29 = vpop.f32.mrb[6].mxu1 }
 0x32e   :  { %v406_v31 = vadd.f32 %v405_v29, %v330_v26  ;;  %v2278_v32 = vpop.f32.mrb[7].mxu1 }
 0x330   :  { %v3064_v33 = vpack.c.bf16 %v406_v31, %v403_v30 }
 0x332   :  { %411 = vrot.lane.b32.xlu0 %v3064_v33, %s2639_s8 }
 0x3a4   :  { %v412_v34 = vpop.permute.xlu0 %411 }
 0x3a5   :  { %v426_v35 = vsel %vm421_vm2, %v412_v34, 0 }
 0x3a6   :  { %2280 = vmatpush3.bf16.xpose.msra.mxu1 %v426_v35 }
 0x3a7   :  { %2285 = vmatprep.subr.bf16.mxu1 %v2637_v11 }
 0x3ad   :  { %2282 = vmatmul.mubr.msk.bf16.vlgmr.msra.gmra.mrb[8].mxu1 %vm421_vm2, %v3064_v33 }
 0x3ae   :  { %2287 = vmatprep.mubr.msk.bf16.mxu1 %vm2638_vm1, %v2637_v11 }
 0x480   :  { %v462_v37 = vpop.f32.mrb[8].mxu1 }
 0x481   :  { %v463_v39 = vadd.f32 %v462_v37, %v3074_v36  ;;  %v2283_v40 = vpop.f32.mrb[9].mxu1 }
 0x482   :  { %v465_v41 = vpop.f32.mrb[10].mxu1 }
 0x483   :  { %v2284_v42 = vpop.f32.mrb[11].mxu1  ;;  %v470_v43 = vsel %vm469_vm3, %v463_v39, -inf  ;;  %v466_v44 = vadd.f32 %v465_v41, %v3076_v38 }
 0x484   :  { %471 = vmax.xlane.f32.xlu1 %v470_v43 }
 0x485   :  { %v473_v45 = vsel %vm469_vm3, %v466_v44, -inf }
 0x486   :  { %474 = vmax.xlane.f32.xlu0 %v473_v45 }
 0x495   :  { %493 = vrot.lane.b32.xlu1 %v3064_v33, %s2640_s11 }
 0x499   :  { %540 = vrot.lane.b32.xlu1 %v3064_v33, %s2641_s12 }
 0x511   :  { %v472_v46 = vpop.xlane.xlu1 %471 }
 0x512   :  { %v476_v47 = vsub.f32 %v463_v39, %v472_v46 }
 0x513   :  { %v475_v48 = vpop.xlane.xlu0 %474 }
 0x514   :  { %v478_v49 = vmul.f32 1.442695, %v476_v47  ;;  %v477_v50 = vsub.f32 %v466_v44, %v475_v48 }
 0x515   :  { %v494_v51 = vpop.permute.xlu1 %493 }
 0x516   :  { %2523 = vpow2.f32 %v478_v49  ;;  %v480_v52 = vmul.f32 1.442695, %v477_v50  ;;  %2286 = vmatpush3.bf16.msra.mxu1 %v494_v51 }
 0x517   :  { %2291 = vmatprep.subr.bf16.mxu1 %v2637_v11 }
 0x518   :  { %2525 = vpow2.f32 %v480_v52 }
 0x519   :  { %v541_v4 = vpop.permute.xlu1 %540 }
 0x520   :  { %v2524_v53 = vpop.eup %2523 }
 0x521   :  { %v482_v54 = vsel %vm469_vm3, %v2524_v53, 0.0 }
 0x522   :  { %v2526_v55 = vpop.eup %2525  ;;  %483 = vadd.xlane.f32.xlu0 %v482_v54 }
 0x523   :  { %v485_v56 = vsel %vm469_vm3, %v2526_v55, 0.0 }
 0x526   :  { %486 = vadd.xlane.f32.xlu0 %v485_v56 }
 0x53c   :  { %542 = vrot.lane.b32.xlu0 %v3064_v33, %s2642_s13 }
 0x5af   :  { %v484_v58 = vpop.xlane.xlu0 %483 }
 0x5b0   :  { %2527 = vrcp.f32 %v484_v58 }
 0x5b3   :  { %v487_v60 = vpop.xlane.xlu0 %486 }
 0x5b4   :  { %2529 = vrcp.f32 %v487_v60 }
 0x5b7   :  { %v543_v1 = vpop.permute.xlu0 %542 }
 0x5b8   :  { %v548_v3 = vsel %vm421_vm2, %v543_v1, 0 }
 0x5ba   :  { %v2528_v61 = vpop.eup %2527 }
 0x5bb   :  { %v490_v63 = vmul.f32 %v2528_v61, %v2524_v53 }
 0x5be   :  { %v2530_v62 = vpop.eup %2529 }
 0x5bf   :  { %v491_v0 = vmul.f32 %v2530_v62, %v2526_v55 }
 0x5c1   :  { %v492_v2 = vpack.c.bf16 %v491_v0, %v490_v63 }
 0x5c3   :  { %2288 = vmatmul.mubr.msk.bf16.vlgmr.msra.gmra.mrb[12].mxu1 %vm469_vm3, %v492_v2 }
 0x5c4   :  { %2292 = vmatpush3.bf16.xpose.msra.mxu1 %v548_v3  ;;  %2293 = vmatprep.mubr.msk.bf16.mxu1 %vm2638_vm1, %v2637_v11 }
 0x5c5   :  { %2297 = vmatprep.subr.bf16.mxu1 %v2637_v11 }
 0x5cb   :  { %2294 = vmatmul.mubr.msk.bf16.vlgmr.msra.gmra.mrb[16].mxu1 %vm421_vm2, %v541_v4 }
 0x5cc   :  { %2299 = vmatprep.mubr.msk.bf16.mxu1 %vm2638_vm1, %v2637_v11 }
 0x696   :  { %v3099_v5 = vpop.f32.mrb[12].mxu1 }
 0x697   :  { %v2289_v6 = vpop.f32.mrb[13].mxu1 }
 0x698   :  { %v3101_v7 = vpop.f32.mrb[14].mxu1 }
 0x699   :  { %v2290_v8 = vpop.f32.mrb[15].mxu1 }
 0x69e   :  { %v584_v9 = vpop.f32.mrb[16].mxu1 }
 0x69f   :  { %v585_v12 = vadd.f32 %v584_v9, %v3074_v36  ;;  %v2295_v13 = vpop.f32.mrb[17].mxu1 }
 0x6a0   :  { %v587_v15 = vpop.f32.mrb[18].mxu1 }
 0x6a1   :  { %v588_v16 = vadd.f32 %v587_v15, %v3076_v38  ;;  %v2296_v17 = vpop.f32.mrb[19].mxu1  ;;  %v591_v18 = vsel %vm469_vm3, %v585_v12, -inf }
 0x6a2   :  { %592 = vmax.xlane.f32.xlu1 %v591_v18 }
 0x6a3   :  { %v594_v19 = vsel %vm469_vm3, %v588_v16, -inf }
 0x6a4   :  { %595 = vmax.xlane.f32.xlu0 %v594_v19 }
 0x6b3   :  { %663 = vrot.lane.b32.xlu1 %v3064_v33, %s2643_s14 }
 0x72f   :  { %v593_v20 = vpop.xlane.xlu1 %592 }
 0x730   :  { %v597_v21 = vsub.f32 %v585_v12, %v593_v20 }
 0x731   :  { %v596_v22 = vpop.xlane.xlu0 %595 }
 0x732   :  { %v599_v23 = vmul.f32 1.442695, %v597_v21  ;;  %v598_v24 = vsub.f32 %v588_v16, %v596_v22 }
 0x733   :  { %v664_v30 = vpop.permute.xlu1 %663 }
 0x734   :  { %2531 = vpow2.f32 %v599_v23  ;;  %v601_v25 = vmul.f32 1.442695, %v598_v24  ;;  %v669_v43 = vsel %vm421_vm2, %v664_v30, 0 }
 0x736   :  { %2533 = vpow2.f32 %v601_v25 }
 0x73e   :  { %v2532_v26 = vpop.eup %2531 }
 0x73f   :  { %v603_v27 = vsel %vm469_vm3, %v2532_v26, 0.0 }
 0x740   :  { %v2534_v28 = vpop.eup %2533  ;;  %604 = vadd.xlane.f32.xlu0 %v603_v27 }
 0x741   :  { %v606_v29 = vsel %vm469_vm3, %v2534_v28, 0.0 }
 0x742   :  { %607 = vadd.xlane.f32.xlu1 %v606_v29 }
 0x753   :  { %661 = vrot.lane.b32.xlu1 %v3064_v33, %s2644_s15 }
 0x756   :  { %614 = vrot.lane.b32.xlu0 %v3064_v33, %s2645_s16 }
 0x757   :  { %784 = vrot.lane.b32.xlu1 %v3064_v33, %s2646_s17 }
 0x75a   :  { %782 = vrot.lane.b32.xlu0 %v3064_v33, %s2647_s18 }
 0x7cd   :  { %v605_v31 = vpop.xlane.xlu0 %604 }
 0x7ce   :  { %2535 = vrcp.f32 %v605_v31 }
 0x7cf   :  { %v608_v32 = vpop.xlane.xlu1 %607 }
 0x7d0   :  { %2537 = vrcp.f32 %v608_v32 }
 0x7d1   :  { %v615_v34 = vpop.permute.xlu0 %614 }
 0x7d2   :  { %2298 = vmatpush3.bf16.msra.mxu1 %v615_v34 }
 0x7d3   :  { %2303 = vmatprep.subr.bf16.mxu1 %v2637_v11  ;;  %v662_v42 = vpop.permute.xlu1 %661 }
 0x7d5   :  { %v783_v46 = vpop.permute.xlu0 %782 }
 0x7d7   :  { %v785_v44 = vpop.permute.xlu1 %784 }
 0x7d8   :  { %v2536_v35 = vpop.eup %2535  ;;  %v790_v45 = vsel %vm421_vm2, %v785_v44, 0 }
 0x7d9   :  { %v611_v39 = vmul.f32 %v2536_v35, %v2532_v26 }
 0x7da   :  { %v2538_v37 = vpop.eup %2537 }
 0x7db   :  { %v612_v40 = vmul.f32 %v2538_v37, %v2534_v28 }
 0x7dd   :  { %v613_v41 = vpack.c.bf16 %v612_v40, %v611_v39 }
 0x7df   :  { %2300 = vmatmul.mubr.msk.bf16.vlgmr.msra.gmra.mrb[20].mxu1 %vm469_vm3, %v613_v41 }
 0x7e0   :  { %2304 = vmatpush3.bf16.xpose.msra.mxu1 %v669_v43  ;;  %2305 = vmatprep.mubr.msk.bf16.mxu1 %vm2638_vm1, %v2637_v11 }
 0x7e1   :  { %2315 = vmatprep.subr.bf16.mxu1 %v2637_v11 }
 0x7e7   :  { %2306 = vmatmul.mubr.msk.bf16.vlgmr.msra.gmra.mrb[24].mxu1 %vm421_vm2, %v662_v42 }
 0x7e8   :  { %2316 = vmatpush3.bf16.xpose.msra.mxu1 %v790_v45  ;;  %2317 = vmatprep.mubr.msk.bf16.mxu1 %vm2638_vm1, %v2637_v11 }
 0x7e9   :  { %2327 = vmatprep.subr.bf16.mxu1 %v2637_v11 }
 0x7ef   :  { %2318 = vmatmul.mubr.msk.bf16.vlgmr.msra.gmra.mrb[28].mxu1 %vm421_vm2, %v783_v46 }
 0x7f0   :  { %2331 = vmatprep.mubr.msk.bf16.mxu1 %vm2638_vm1, %v2637_v11 }
 0x8b2   :  { %v654_v47 = vpop.f32.mrb[20].mxu1 }
 0x8b3   :  { %v2301_v48 = vpop.f32.mrb[21].mxu1 }
 0x8b4   :  { %v657_v49 = vpop.f32.mrb[22].mxu1 }
 0x8b5   :  { %v2489_v50 = vpack.i.bf16 %v657_v49, %v654_v47  ;;  %v2302_v51 = vpop.f32.mrb[23].mxu1 }
 0x8ba   :  { %v705_v52 = vpop.f32.mrb[24].mxu1 }
 0x8bb   :  { %v706_v53 = vadd.f32 %v705_v52, %v3074_v36  ;;  %v2307_v54 = vpop.f32.mrb[25].mxu1 }
 0x8bc   :  { %v708_v55 = vpop.f32.mrb[26].mxu1 }
 0x8bd   :  { %v709_v56 = vadd.f32 %v708_v55, %v3076_v38  ;;  %v2308_v58 = vpop.f32.mrb[27].mxu1  ;;  %v712_v60 = vsel %vm469_vm3, %v706_v53, -inf }
 0x8be   :  { %713 = vmax.xlane.f32.xlu1 %v712_v60 }
 0x8bf   :  { %v715_v61 = vsel %vm469_vm3, %v709_v56, -inf }
 0x8c0   :  { %716 = vmax.xlane.f32.xlu0 %v715_v61 }
 0x8c2   :  { %v826_v62 = vpop.f32.mrb[28].mxu1 }
 0x8c3   :  { %v827_v63 = vadd.f32 %v826_v62, %v3074_v36  ;;  %v2319_v0 = vpop.f32.mrb[29].mxu1 }
 0x8c4   :  { %v829_v1 = vpop.f32.mrb[30].mxu1 }
 0x8c5   :  { %v830_v2 = vadd.f32 %v829_v1, %v3076_v38  ;;  %v2320_v3 = vpop.f32.mrb[31].mxu1  ;;  %v833_v4 = vsel %vm469_vm3, %v827_v63, -inf }
 0x8c6   :  { %834 = vmax.xlane.f32.xlu0 %v833_v4 }
 0x8c7   :  { %v836_v6 = vsel %vm469_vm3, %v830_v2, -inf }
 0x8ca   :  { %837 = vmax.xlane.f32.xlu0 %v836_v6 }
 0x94b   :  { %v714_v8 = vpop.xlane.xlu1 %713 }
 0x94c   :  { %v718_v9 = vsub.f32 %v706_v53, %v714_v8 }
 0x94d   :  { %v717_v12 = vpop.xlane.xlu0 %716 }
 0x94e   :  { %v720_v13 = vmul.f32 1.442695, %v718_v9  ;;  %v719_v15 = vsub.f32 %v709_v56, %v717_v12 }
 0x950   :  { %2539 = vpow2.f32 %v720_v13  ;;  %v722_v16 = vmul.f32 1.442695, %v719_v15 }
 0x952   :  { %2541 = vpow2.f32 %v722_v16 }
 0x953   :  { %v835_v17 = vpop.xlane.xlu0 %834 }
 0x954   :  { %v839_v18 = vsub.f32 %v827_v63, %v835_v17 }
 0x956   :  { %v841_v19 = vmul.f32 1.442695, %v839_v18 }
 0x957   :  { %v838_v20 = vpop.xlane.xlu0 %837 }
 0x958   :  { %2543 = vpow2.f32 %v841_v19  ;;  %v840_v21 = vsub.f32 %v830_v2, %v838_v20 }
 0x95a   :  { %v2540_v22 = vpop.eup %2539  ;;  %v843_v23 = vmul.f32 1.442695, %v840_v21 }
 0x95b   :  { %v724_v24 = vsel %vm469_vm3, %v2540_v22, 0.0 }
 0x95c   :  { %v2542_v25 = vpop.eup %2541  ;;  %2545 = vpow2.f32 %v843_v23  ;;  %725 = vadd.xlane.f32.xlu1 %v724_v24 }
 0x95d   :  { %v727_v26 = vsel %vm469_vm3, %v2542_v25, 0.0 }
 0x95e   :  { %728 = vadd.xlane.f32.xlu0 %v727_v26 }
 0x962   :  { %v2544_v27 = vpop.eup %2543 }
 0x963   :  { %v845_v28 = vsel %vm469_vm3, %v2544_v27, 0.0 }
 0x964   :  { %846 = vadd.xlane.f32.xlu1 %v845_v28 }
 0x966   :  { %v2546_v29 = vpop.eup %2545 }
 0x967   :  { %v848_v30 = vsel %vm469_vm3, %v2546_v29, 0.0 }
 0x968   :  { %849 = vadd.xlane.f32.xlu0 %v848_v30 }
 0x975   :  { %735 = vrot.lane.b32.xlu1 %v3064_v33, %s2648_s19 }
 0x979   :  { %937 = vrot.lane.b32.xlu1 %v3034_v10, %s2649_s20 }
 0x97d   :  { %2490 = vrot.lane.b32.xlu1 %v2489_v50, %s2650_s21 }
 0x97e   :  { %856 = vrot.lane.b32.xlu0 %v3064_v33, %s2651_s22 }
 0x9e9   :  { %v726_v31 = vpop.xlane.xlu1 %725 }
 0x9ea   :  { %2547 = vrcp.f32 %v726_v31 }
 0x9eb   :  { %v729_v32 = vpop.xlane.xlu0 %728 }
 0x9ec   :  { %2549 = vrcp.f32 %v729_v32 }
 0x9f1   :  { %v847_v34 = vpop.xlane.xlu1 %846 }
 0x9f2   :  { %2551 = vrcp.f32 %v847_v34 }
 0x9f4   :  { %v2548_v35 = vpop.eup %2547 }
 0x9f5   :  { %v736_v37 = vpop.permute.xlu1 %735  ;;  %v850_v39 = vpop.xlane.xlu0 %849  ;;  %v732_v10 = vmul.f32 %v2548_v35, %v2540_v22 }
 0x9f6   :  { %v2550_v40 = vpop.eup %2549  ;;  %2553 = vrcp.f32 %v850_v39  ;;  %2310 = vmatpush3.bf16.msra.mxu0 %v736_v37  ;;  %v310_v37 = vld [vmem:[%s3564_s2 + $0x8] sm:$0xff]  ;;  %v311_v39 = vld [vmem:[%s3564_s2 + $0x30] sm:$0xff] }
 0x9f7   :  { %v733_v41 = vmul.f32 %v2550_v40, %v2542_v25  ;;  %2321 = vmatprep.subr.bf16.mxu0 %v2637_v11  ;;  %v1018_v40 = vpack.c.bf16 %v311_v39, %v310_v37 }
 0x9f9   :  { %v938_v42 = vpop.permute.xlu1 %937  ;;  %v857_v43 = vpop.permute.xlu0 %856  ;;  %v734_v44 = vpack.c.bf16 %v733_v41, %v732_v10  ;;  %v312_v10 = vld [vmem:[%s3564_s2 + $0x58] sm:$0xff]  ;;  %v313_v41 = vld [vmem:[%s3564_s2 + $0x80] sm:$0xff] }
 0x9fa   :  { %2328 = vmatpush3.bf16.msra.mxu1 %v938_v42  ;;  %v1019_v42 = vpack.c.bf16 %v313_v41, %v312_v10 }
 0x9fb   :  { %2312 = vmatmul.mubr.msk.bf16.vlgmr.msra.gmra.mrb[8].mxu0 %vm469_vm3, %v734_v44  ;;  %2329 = vmatprep.subr.bf16.mxu1 %v2637_v11 }
 0x9fc   :  { %2322 = vmatpush3.bf16.msra.mxu0 %v857_v43  ;;  %2323 = vmatprep.mubr.msk.bf16.mxu0 %vm2638_vm1, %v2637_v11  ;;  %v2552_v33 = vpop.eup %2551 }
 0x9fd   :  { %2335 = vmatprep.subr.bf16.mxu0 %v2637_v11  ;;  %v853_v46 = vmul.f32 %v2552_v33, %v2544_v27  ;;  %v2491_v61 = vpop.permute.xlu1 %2490 }
 0x9fe   :  { %v2493_v0 = vunpack.i.h.bf16 %v2491_v61  ;;  %v2492_v1 = vunpack.i.l.bf16 %v2491_v61  ;;  %v318_v61 = vld [vmem:[%s3563_s1 + $0x320] sm:$0xff] }
 0xa00   :  { %v2554_v45 = vpop.eup %2553  ;;  %v928_v4 = vsel %vm421_vm2, %v3101_v7, %v2493_v0  ;;  %v927_v6 = vsel %vm421_vm2, %v3099_v5, %v2492_v1  ;;  %v331_v5 = vld [vmem:[%s3565_s3 + $0x1] ss:$0 sm:$0xff]  ;;  %v320_v0 = vld [vmem:[%s3563_s1 + $0x330] sm:$0xff]  ;;  %v321_v1 = vld [vmem:[%s3563_s1 + $0x338] sm:$0xff] }
 0xa01   :  { %v854_v47 = vmul.f32 %v2554_v45, %v2546_v29 }
 0xa03   :  { %v855_v48 = vpack.c.bf16 %v854_v47, %v853_v46 }
 0xa05   :  { %2324 = vmatmul.mubr.msk.bf16.vlgmr.msra.gmra.mrb[12].mxu0 %vm469_vm3, %v855_v48 }
 0xa06   :  { %2339 = vmatprep.mubr.msk.bf16.mxu0 %vm2638_vm1, %v2637_v11  ;;  %2336 = vmatpush3.bf16.msra.mxu0 %v1018_v40 }
 0xa07   :  { %2337 = vmatprep.subr.bf16.mxu0 %v2637_v11 }
 0xa0a   :  { %2338 = vmatpush3.bf16.msra.mxu0 %v1019_v42 }
 0xa0b   :  { %2363 = vmatprep.subr.bf16.mxu0 %v2637_v11 }
 0xace   :  { %v775_v49 = vpop.f32.mrb[8].mxu0 }
 0xacf   :  { %v2313_v50 = vpop.f32.mrb[9].mxu0 }
 0xad0   :  { %v778_v51 = vpop.f32.mrb[10].mxu0 }
 0xad1   :  { %v2494_v52 = vpack.i.bf16 %v778_v51, %v775_v49  ;;  %v2314_v53 = vpop.f32.mrb[11].mxu0 }
 0xad2   :  { %v314_v53 = vld [vmem:[%s3563_s1 + $0x300] sm:$0xff] }
 0xad3   :  { %2495 = vrot.lane.b32.xlu1 %v2494_v52, %s2652_s23 }
 0xad7   :  { %939 = vrot.lane.b32.xlu1 %v3046_v14, %s2649_s20 }
 0xad8   :  { %v896_v54 = vpop.f32.mrb[12].mxu0 }
 0xad9   :  { %v2325_v55 = vpop.f32.mrb[13].mxu0 }
 0xada   :  { %v899_v56 = vpop.f32.mrb[14].mxu0 }
 0xadb   :  { %v2499_v58 = vpack.i.bf16 %v899_v56, %v896_v54  ;;  %v2326_v60 = vpop.f32.mrb[15].mxu0  ;;  %v315_v54 = vld [vmem:[%s3563_s1 + $0x308] sm:$0xff]  ;;  %v316_v56 = vld [vmem:[%s3563_s1 + $0x310] sm:$0xff] }
 0xadc   :  { %v1083_v55 = vpack.c.bf16 %v315_v54, %v314_v53 }
 0xadd   :  { %2500 = vrot.lane.b32.xlu0 %v2499_v58, %s2653_s24  ;;  %v317_v58 = vld [vmem:[%s3563_s1 + $0x318] sm:$0xff] }
 0xade   :  { %v1084_v60 = vpack.c.bf16 %v317_v58, %v316_v56 }
 0xb45   :  { %v2496_v62 = vpop.permute.xlu1 %2495 }
 0xb46   :  { %v2498_v2 = vunpack.i.h.bf16 %v2496_v62  ;;  %v2497_v3 = vunpack.i.l.bf16 %v2496_v62  ;;  %v319_v62 = vld [vmem:[%s3563_s1 + $0x328] sm:$0xff] }
 0xb48   :  { %v930_v12 = vsel %vm469_vm3, %v928_v4, %v2498_v2  ;;  %v929_v13 = vsel %vm469_vm3, %v927_v6, %v2497_v3  ;;  %v1086_v2 = vpack.c.bf16 %v321_v1, %v320_v0  ;;  %v322_v3 = vld [vmem:[%s3563_s1 + $0x340] sm:$0xff]  ;;  %v324_v6 = vld [vmem:[%s3563_s1 + $0x350] sm:$0xff] }
 0xb49   :  { %v940_v63 = vpop.permute.xlu1 %939  ;;  %v1136_v1 = vld [vmem:[%s3564_s2 + $0x10] sm:$0xff] }
 0xb4a   :  { %2330 = vmatpush3.bf16.msra.mxu1 %v940_v63  ;;  %v1085_v63 = vpack.c.bf16 %v319_v62, %v318_v61 }
 0xb4b   :  { %2343 = vmatprep.subr.bf16.mxu1 %v2637_v11 }
 0xb4f   :  { %v2501_v14 = vpop.permute.xlu0 %2500 }
 0xb50   :  { %v2503_v8 = vunpack.i.h.bf16 %v2501_v14  ;;  %v2502_v9 = vunpack.i.l.bf16 %v2501_v14  ;;  %v323_v14 = vld [vmem:[%s3563_s1 + $0x348] sm:$0xff] }
 0xb51   :  { %v1087_v4 = vpack.c.bf16 %v323_v14, %v322_v3  ;;  %v1138_v14 = vld [vmem:[%s3564_s2 + $0x60] sm:$0xff] }
 0xb52   :  { %v933_v15 = vsel %vm931_vm4, %v930_v12, %v2503_v8  ;;  %v932_v16 = vsel %vm931_vm4, %v929_v13, %v2502_v9  ;;  %v325_v8 = vld [vmem:[%s3563_s1 + $0x358] sm:$0xff]  ;;  %v326_v12 = vld [vmem:[%s3563_s1 + $0x360] sm:$0xff]  ;;  %v327_v13 = vld [vmem:[%s3563_s1 + $0x368] sm:$0xff] }
 0xb53   :  { %v934_v17 = vpack.c.bf16 %v933_v15, %v932_v16  ;;  %v1088_v9 = vpack.c.bf16 %v325_v8, %v324_v6  ;;  %v1089_v15 = vpack.c.bf16 %v327_v13, %v326_v12  ;;  %v328_v16 = vld [vmem:[%s3563_s1 + $0x370] sm:$0xff] }
 0xb55   :  { %2332 = vmatmul.mubr.msk.bf16.vlgmr.msra.gmra.mrb[32].mxu1 %vm334_vm0, %v934_v17  ;;  %v329_v17 = vld [vmem:[%s3563_s1 + $0x378] sm:$0xff] }
 0xb56   :  { %2359 = vmatprep.mubr.msk.bf16.mxu1 %vm2638_vm1, %v2637_v11  ;;  %2344 = vmatpush3.bf16.msra.mxu1 %v1083_v55 }
 0xb57   :  { %2345 = vmatprep.subr.bf16.mxu1 %v2637_v11 }
 0xb5a   :  { %2346 = vmatpush3.bf16.msra.mxu1 %v1084_v60 }
 0xb5b   :  { %2347 = vmatprep.subr.bf16.mxu1 %v2637_v11 }
 0xb5e   :  { %2348 = vmatpush3.bf16.msra.mxu1 %v1085_v63 }
 0xb5f   :  { %2349 = vmatprep.subr.bf16.mxu1 %v2637_v11 }
 0xb62   :  { %2350 = vmatpush3.bf16.msra.mxu1 %v1086_v2  ;;  %v1137_v2 = vld [vmem:[%s3564_s2 + $0x38] sm:$0xff] }
 0xb63   :  { %2351 = vmatprep.subr.bf16.mxu1 %v2637_v11  ;;  %v3295_v3 = vpack.c.bf16 %v1137_v2, %v1136_v1 }
 0xb66   :  { %2352 = vmatpush3.bf16.msra.mxu1 %v1087_v4  ;;  %v1139_v4 = vld [vmem:[%s3564_s2 + $0x88] sm:$0xff] }
 0xb67   :  { %2353 = vmatprep.subr.bf16.mxu1 %v2637_v11  ;;  %v3305_v6 = vpack.c.bf16 %v1139_v4, %v1138_v14 }
 0xb6a   :  { %2354 = vmatpush3.bf16.msra.mxu1 %v1088_v9 }
 0xb6b   :  { %2355 = vmatprep.subr.bf16.mxu1 %v2637_v11 }
 0xb6e   :  { %2356 = vmatpush3.bf16.msra.mxu1 %v1089_v15 }
 0xb6f   :  { %2357 = vmatprep.subr.bf16.mxu1 %v2637_v11 }
 0xc28   :  { %v980_v7 = vpop.f32.mrb[32].mxu1 }
 0xc29   :  { %v987_v18 = vadd.f32 %v980_v7, %v3016_v57  ;;  %v2333_v19 = vpop.f32.mrb[33].mxu1  ;;  %v332_v7 = vld [vmem:[%s3565_s3 + $0x2] ss:$0 sm:$0xff] }
 0xc2a   :  { %v983_v20 = vpop.f32.mrb[34].mxu1 }
 0xc2b   :  { %v3181_v21 = vadd.f32 %v987_v18, %v331_v5  ;;  %v988_v22 = vadd.f32 %v983_v20, %v3018_v59  ;;  %v2334_v23 = vpop.f32.mrb[35].mxu1 }
 0xc2d   :  { %v3184_v24 = vadd.f32 %v988_v22, %v331_v5  ;;  %v991_v25 = vsel %vm334_vm0, %v3181_v21, 0.0  ;;  %v1090_v5 = vpack.c.bf16 %v329_v17, %v328_v16 }
 0xc2e   :  { %992 = vadd.xlane.f32.xlu0 %v991_v25 }
 0xc2f   :  { %v994_v26 = vsel %vm334_vm0, %v3184_v24, 0.0  ;;  %2358 = vmatpush3.bf16.msra.mxu1 %v1090_v5 }
 0xc30   :  { %995 = vadd.xlane.f32.xlu1 %v994_v26  ;;  %2389 = vmatprep.subr.bf16.mxu1 %v2637_v11 }
 0xcbb   :  { %v993_v27 = vpop.xlane.xlu0 %992 }
 0xcbc   :  { %v997_v28 = vmul.f32 0.03125, %v993_v27 }
 0xcbd   :  { %v996_v57 = vpop.xlane.xlu1 %995 }
 0xcbe   :  { %v999_v29 = vsub.f32 %v3181_v21, %v997_v28  ;;  %v998_v30 = vmul.f32 0.03125, %v996_v57 }
 0xcc0   :  { %v1000_v31 = vsub.f32 %v3184_v24, %v998_v30  ;;  %v1001_v59 = vmul.f32 %v999_v29, %v999_v29 }
 0xcc2   :  { %v1003_v32 = vsel %vm334_vm0, %v1001_v59, 0.0  ;;  %v1002_v34 = vmul.f32 %v1000_v31, %v1000_v31 }
 0xcc3   :  { %1004 = vadd.xlane.f32.xlu0 %v1003_v32 }
 0xcc4   :  { %v1006_v35 = vsel %vm334_vm0, %v1002_v34, 0.0 }
 0xcc7   :  { %1007 = vadd.xlane.f32.xlu0 %v1006_v35 }
 0xd50   :  { %v1005_v43 = vpop.xlane.xlu0 %1004 }
 0xd51   :  { %v1009_v44 = vmul.f32 0.03125, %v1005_v43 }
 0xd53   :  { %v1011_v33 = vadd.f32 1e-06, %v1009_v44 }
 0xd54   :  { %v1008_v45 = vpop.xlane.xlu0 %1007 }
 0xd55   :  { %v1010_v46 = vmul.f32 0.03125, %v1008_v45  ;;  %2555 = vrsqrt.f32 %v1011_v33  ;;  %v333_v33 = vld [vmem:[%s3565_s3 + $0x3] ss:$0 sm:$0xff] }
 0xd57   :  { %v1012_v47 = vadd.f32 1e-06, %v1010_v46 }
 0xd59   :  { %2557 = vrsqrt.f32 %v1012_v47 }
 0xd5f   :  { %v2556_v48 = vpop.eup %2555 }
 0xd60   :  { %v1015_v50 = vmul.f32 %v2556_v48, %v999_v29 }
 0xd63   :  { %v2558_v49 = vpop.eup %2557 }
 0xd64   :  { %v1016_v51 = vmul.f32 %v2558_v49, %v1000_v31 }
 0xd66   :  { %v1017_v52 = vpack.c.bf16 %v1016_v51, %v1015_v50 }
 0xd68   :  { %2340 = vmatmul.mubr.msk.bf16.vlgmr.msra.gmra.mrb[16].mxu0 %vm334_vm0, %v1017_v52 }
 0xd69   :  { %2367 = vmatprep.mubr.msk.bf16.mxu0 %vm2638_vm1, %v2637_v11  ;;  %2364 = vmatpush3.bf16.msra.mxu0 %v3295_v3 }
 0xd6a   :  { %2365 = vmatprep.subr.bf16.mxu0 %v2637_v11 }
 0xd6d   :  { %2366 = vmatpush3.bf16.msra.mxu0 %v3305_v6 }
 0xd6e   :  { %2371 = vmatprep.subr.bf16.mxu0 %v2637_v11 }
 0xe3b   :  { %v1057_v18 = vpop.f32.mrb[16].mxu0 }
 0xe3c   :  { %v1058_v19 = vadd.f32 %v1057_v18, %v332_v7  ;;  %v2341_v20 = vpop.f32.mrb[17].mxu0 }
 0xe3d   :  { %v1060_v22 = vpop.f32.mrb[18].mxu0  ;;  %v1160_v20 = vld [vmem:[%s3565_s3 + $0x4] ss:$0 sm:$0xff] }
 0xe3e   :  { %v1064_v23 = vmul.f32 %v1058_v19, %v1058_v19  ;;  %v1061_v25 = vadd.f32 %v1060_v22, %v332_v7  ;;  %v2342_v26 = vpop.f32.mrb[19].mxu0 }
 0xe40   :  { %v1066_v27 = vmul.f32 %v1064_v23, %v1058_v19  ;;  %v1065_v28 = vmul.f32 %v1061_v25, %v1061_v25 }
 0xe42   :  { %v1068_v57 = vmul.f32 0.044715, %v1066_v27  ;;  %v1067_v29 = vmul.f32 %v1065_v28, %v1061_v25 }
 0xe44   :  { %v1070_v30 = vadd.f32 %v1068_v57, %v1058_v19  ;;  %v1069_v31 = vmul.f32 0.044715, %v1067_v29 }
 0xe46   :  { %v1072_v59 = vmul.f32 0.7978846, %v1070_v30  ;;  %v1071_v32 = vadd.f32 %v1069_v31, %v1061_v25 }
 0xe48   :  { %2559 = vtanh.f32 %v1072_v59  ;;  %v1073_v34 = vmul.f32 0.7978846, %v1071_v32 }
 0xe4a   :  { %2561 = vtanh.f32 %v1073_v34 }
 0xe52   :  { %v2560_v35 = vpop.eup %2559 }
 0xe53   :  { %v1076_v37 = vadd.f32 1.0, %v2560_v35 }
 0xe54   :  { %v2562_v39 = vpop.eup %2561 }
 0xe55   :  { %v1078_v40 = vmul.f32 0.5, %v1076_v37  ;;  %v1077_v10 = vadd.f32 1.0, %v2562_v39 }
 0xe57   :  { %v1079_v41 = vmul.f32 0.5, %v1077_v10  ;;  %v1080_v42 = vmul.f32 %v1078_v40, %v1058_v19 }
 0xe59   :  { %v1081_v43 = vmul.f32 %v1079_v41, %v1061_v25 }
 0xe5b   :  { %v1082_v44 = vpack.c.bf16 %v1081_v43, %v1080_v42 }
 0xe5d   :  { %2360 = vmatmul.mubr.bf16.vlgmr.msra.gmra.mrb[36].mxu1 %v1082_v44 }
 0xe5e   :  { %2391 = vmatprep.mubr.msk.bf16.mxu1 %vm2638_vm1, %v2637_v11 }
 0xf30   :  { %v1125_v45 = vpop.f32.mrb[36].mxu1 }
 0xf31   :  { %v1132_v46 = vadd.f32 %v1125_v45, %v3181_v21  ;;  %v2361_v47 = vpop.f32.mrb[37].mxu1 }
 0xf32   :  { %v1128_v48 = vpop.f32.mrb[38].mxu1 }
 0xf33   :  { %v3276_v49 = vadd.f32 %v1132_v46, %v333_v33  ;;  %v1133_v50 = vadd.f32 %v1128_v48, %v3184_v24  ;;  %v2362_v51 = vpop.f32.mrb[39].mxu1 }
 0xf35   :  { %v3279_v52 = vadd.f32 %v1133_v50, %v333_v33  ;;  %v1164_v53 = vsel %vm334_vm0, %v3276_v49, 0.0 }
 0xf36   :  { %1165 = vadd.xlane.f32.xlu0 %v1164_v53 }
 0xf37   :  { %v1167_v54 = vsel %vm334_vm0, %v3279_v52, 0.0 }
 0xf38   :  { %1168 = vadd.xlane.f32.xlu1 %v1167_v54 }
 0xfc3   :  { %v1166_v55 = vpop.xlane.xlu0 %1165 }
 0xfc4   :  { %v1170_v56 = vmul.f32 0.03125, %v1166_v55 }
 0xfc5   :  { %v1169_v21 = vpop.xlane.xlu1 %1168 }
 0xfc6   :  { %v1172_v58 = vsub.f32 %v3276_v49, %v1170_v56  ;;  %v1171_v60 = vmul.f32 0.03125, %v1169_v21 }
 0xfc8   :  { %v1173_v61 = vsub.f32 %v3279_v52, %v1171_v60  ;;  %v1174_v24 = vmul.f32 %v1172_v58, %v1172_v58 }
 0xfca   :  { %v1176_v62 = vsel %vm334_vm0, %v1174_v24, 0.0  ;;  %v1175_v63 = vmul.f32 %v1173_v61, %v1173_v61 }
 0xfcb   :  { %1177 = vadd.xlane.f32.xlu0 %v1176_v62 }
 0xfcc   :  { %v1179_v0 = vsel %vm334_vm0, %v1175_v63, 0.0 }
 0xfcd   :  { %1180 = vadd.xlane.f32.xlu1 %v1179_v0 }
0x1058   :  { %v1178_v8 = vpop.xlane.xlu0 %1177 }
0x1059   :  { %v1182_v9 = vmul.f32 0.03125, %v1178_v8 }
0x105a   :  { %v1181_v12 = vpop.xlane.xlu1 %1180 }
0x105b   :  { %v1184_v13 = vadd.f32 1e-06, %v1182_v9  ;;  %v1183_v15 = vmul.f32 0.03125, %v1181_v12 }
0x105d   :  { %2563 = vrsqrt.f32 %v1184_v13  ;;  %v1185_v16 = vadd.f32 1e-06, %v1183_v15 }
0x105f   :  { %2565 = vrsqrt.f32 %v1185_v16 }
0x1067   :  { %v2564_v17 = vpop.eup %2563 }
0x1068   :  { %v1188_v7 = vmul.f32 %v2564_v17, %v1172_v58 }
0x1069   :  { %v2566_v5 = vpop.eup %2565 }
0x106a   :  { %v1189_v18 = vmul.f32 %v2566_v5, %v1173_v61 }
0x106c   :  { %v1190_v19 = vpack.c.bf16 %v1189_v18, %v1188_v7 }
0x106e   :  { %2368 = vmatmul.mubr.msk.bf16.vlgmr.msra.gmra.mrb[20].mxu0 %vm334_vm0, %v1190_v19 }
0x106f   :  { %2373 = vmatprep.mubr.msk.bf16.mxu0 %vm2638_vm1, %v2637_v11 }
0x1141   :  { %v1230_v22 = vpop.f32.mrb[20].mxu0 }
0x1142   :  { %v2369_v23 = vpop.f32.mrb[21].mxu0  ;;  %v1231_v26 = vadd.f32 %v1230_v22, %v1160_v20 }
0x1143   :  { %v1233_v25 = vpop.f32.mrb[22].mxu0 }
0x1144   :  { %v1234_v27 = vadd.f32 %v1233_v25, %v1160_v20  ;;  %v2370_v28 = vpop.f32.mrb[23].mxu0 }
0x1146   :  { %v3315_v57 = vpack.c.bf16 %v1234_v27, %v1231_v26 }
0x1148   :  { %1239 = vrot.lane.b32.xlu0 %v3315_v57, %s2639_s8 }
0x114c   :  { %1360 = vrot.lane.b32.xlu0 %v3315_v57, %s2642_s13 }
0x1150   :  { %1358 = vrot.lane.b32.xlu0 %v3315_v57, %s2641_s12 }
0x1154   :  { %1481 = vrot.lane.b32.xlu0 %v3315_v57, %s2643_s14 }
0x1158   :  { %1602 = vrot.lane.b32.xlu0 %v3315_v57, %s2646_s17 }
0x11ba   :  { %v1240_v29 = vpop.permute.xlu0 %1239 }
0x11bb   :  { %v1245_v30 = vsel %vm421_vm2, %v1240_v29, 0 }
0x11bc   :  { %2372 = vmatpush3.bf16.xpose.msra.mxu0 %v1245_v30 }
0x11bd   :  { %2377 = vmatprep.subr.bf16.mxu0 %v2637_v11 }
0x11be   :  { %v1361_v55 = vpop.permute.xlu0 %1360 }
0x11bf   :  { %v1366_v24 = vsel %vm421_vm2, %v1361_v55, 0 }
0x11c2   :  { %v1359_v61 = vpop.permute.xlu0 %1358 }
0x11c3   :  { %2374 = vmatmul.mubr.msk.bf16.vlgmr.msra.gmra.mrb[24].mxu0 %vm421_vm2, %v3315_v57 }
0x11c4   :  { %2379 = vmatprep.mubr.msk.bf16.mxu0 %vm2638_vm1, %v2637_v11 }
0x11c6   :  { %v1482_v62 = vpop.permute.xlu0 %1481 }
0x11c7   :  { %v1487_v63 = vsel %vm421_vm2, %v1482_v62, 0 }
0x11ca   :  { %v1603_v0 = vpop.permute.xlu0 %1602 }
0x11cb   :  { %v1608_v2 = vsel %vm421_vm2, %v1603_v0, 0 }
0x1296   :  { %v1281_v31 = vpop.f32.mrb[24].mxu0 }
0x1297   :  { %v1282_v59 = vadd.f32 %v1281_v31, %v3074_v36  ;;  %v2375_v32 = vpop.f32.mrb[25].mxu0 }
0x1298   :  { %v1284_v34 = vpop.f32.mrb[26].mxu0 }
0x1299   :  { %v1285_v35 = vadd.f32 %v1284_v34, %v3076_v38  ;;  %v2376_v37 = vpop.f32.mrb[27].mxu0  ;;  %v1288_v39 = vsel %vm469_vm3, %v1282_v59, -inf }
0x129a   :  { %1289 = vmax.xlane.f32.xlu1 %v1288_v39 }
0x129b   :  { %v1291_v40 = vsel %vm469_vm3, %v1285_v35, -inf }
0x129e   :  { %1292 = vmax.xlane.f32.xlu1 %v1291_v40 }
0x1327   :  { %v1290_v10 = vpop.xlane.xlu1 %1289 }
0x1328   :  { %v1294_v41 = vsub.f32 %v1282_v59, %v1290_v10 }
0x132a   :  { %v1296_v42 = vmul.f32 1.442695, %v1294_v41 }
0x132b   :  { %v1293_v43 = vpop.xlane.xlu1 %1292 }
0x132c   :  { %2567 = vpow2.f32 %v1296_v42  ;;  %v1295_v44 = vsub.f32 %v1285_v35, %v1293_v43 }
0x132e   :  { %v1298_v33 = vmul.f32 1.442695, %v1295_v44 }
0x1330   :  { %2569 = vpow2.f32 %v1298_v33 }
0x1336   :  { %v2568_v45 = vpop.eup %2567 }
0x1337   :  { %v1300_v46 = vsel %vm469_vm3, %v2568_v45, 0.0 }
0x1338   :  { %1301 = vadd.xlane.f32.xlu1 %v1300_v46 }
0x133a   :  { %v2570_v47 = vpop.eup %2569 }
0x133b   :  { %v1303_v48 = vsel %vm469_vm3, %v2570_v47, 0.0 }
0x133c   :  { %1304 = vadd.xlane.f32.xlu1 %v1303_v48 }
0x134d   :  { %1311 = vrot.lane.b32.xlu1 %v3315_v57, %s2640_s11 }
0x1351   :  { %1479 = vrot.lane.b32.xlu1 %v3315_v57, %s2644_s15 }
0x1355   :  { %1600 = vrot.lane.b32.xlu1 %v3315_v57, %s2647_s18 }
0x13c5   :  { %v1302_v50 = vpop.xlane.xlu1 %1301 }
0x13c6   :  { %2571 = vrcp.f32 %v1302_v50 }
0x13c9   :  { %v1305_v51 = vpop.xlane.xlu1 %1304 }
0x13ca   :  { %2573 = vrcp.f32 %v1305_v51 }
0x13cd   :  { %v1312_v53 = vpop.permute.xlu1 %1311 }
0x13ce   :  { %2378 = vmatpush3.bf16.msra.mxu0 %v1312_v53 }
0x13cf   :  { %2383 = vmatprep.subr.bf16.mxu0 %v2637_v11 }
0x13d0   :  { %v2572_v54 = vpop.eup %2571 }
0x13d1   :  { %v1308_v21 = vmul.f32 %v2572_v54, %v2568_v45  ;;  %v1480_v1 = vpop.permute.xlu1 %1479 }
0x13d4   :  { %v2574_v56 = vpop.eup %2573 }
0x13d5   :  { %v1309_v58 = vmul.f32 %v2574_v56, %v2570_v47  ;;  %v1601_v14 = vpop.permute.xlu1 %1600 }
0x13d7   :  { %v1310_v60 = vpack.c.bf16 %v1309_v58, %v1308_v21 }
0x13d9   :  { %2380 = vmatmul.mubr.msk.bf16.vlgmr.msra.gmra.mrb[28].mxu0 %vm469_vm3, %v1310_v60 }
0x13da   :  { %2384 = vmatpush3.bf16.xpose.msra.mxu0 %v1366_v24  ;;  %2385 = vmatprep.mubr.msk.bf16.mxu0 %vm2638_vm1, %v2637_v11 }
0x13db   :  { %2395 = vmatprep.subr.bf16.mxu0 %v2637_v11 }
0x13e1   :  { %2386 = vmatmul.mubr.msk.bf16.vlgmr.msra.gmra.mrb[32].mxu0 %vm421_vm2, %v1359_v61 }
0x13e2   :  { %2396 = vmatpush3.bf16.xpose.msra.mxu0 %v1487_v63  ;;  %2397 = vmatprep.mubr.msk.bf16.mxu0 %vm2638_vm1, %v2637_v11 }
0x13e3   :  { %2407 = vmatprep.subr.bf16.mxu0 %v2637_v11 }
0x13e9   :  { %2398 = vmatmul.mubr.msk.bf16.vlgmr.msra.gmra.mrb[36].mxu0 %vm421_vm2, %v1480_v1 }
0x13ea   :  { %2408 = vmatpush3.bf16.xpose.msra.mxu0 %v1608_v2  ;;  %2409 = vmatprep.mubr.msk.bf16.mxu0 %vm2638_vm1, %v2637_v11 }
0x13eb   :  { %2419 = vmatprep.subr.bf16.mxu0 %v2637_v11 }
0x13f1   :  { %2410 = vmatmul.mubr.msk.bf16.vlgmr.msra.gmra.mrb[40].mxu0 %vm421_vm2, %v1601_v14 }
0x13f2   :  { %2423 = vmatprep.mubr.msk.bf16.mxu0 %vm2638_vm1, %v2637_v11 }
0x14ac   :  { %v3364_v4 = vpop.f32.mrb[28].mxu0 }
0x14ad   :  { %v2381_v8 = vpop.f32.mrb[29].mxu0 }
0x14ae   :  { %v3366_v9 = vpop.f32.mrb[30].mxu0 }
0x14af   :  { %v2382_v12 = vpop.f32.mrb[31].mxu0 }
0x14b4   :  { %v1402_v13 = vpop.f32.mrb[32].mxu0 }
0x14b5   :  { %v1403_v15 = vadd.f32 %v1402_v13, %v3074_v36  ;;  %v2387_v16 = vpop.f32.mrb[33].mxu0 }
0x14b6   :  { %v1405_v17 = vpop.f32.mrb[34].mxu0 }
0x14b7   :  { %v1406_v5 = vadd.f32 %v1405_v17, %v3076_v38  ;;  %v2388_v7 = vpop.f32.mrb[35].mxu0  ;;  %v1409_v18 = vsel %vm469_vm3, %v1403_v15, -inf }
0x14b8   :  { %1410 = vmax.xlane.f32.xlu0 %v1409_v18 }
0x14b9   :  { %v1412_v19 = vsel %vm469_vm3, %v1406_v5, -inf }
0x14ba   :  { %1413 = vmax.xlane.f32.xlu1 %v1412_v19 }
0x14bc   :  { %v1523_v20 = vpop.f32.mrb[36].mxu0 }
0x14bd   :  { %v1524_v22 = vadd.f32 %v1523_v20, %v3074_v36  ;;  %v2399_v23 = vpop.f32.mrb[37].mxu0 }
0x14be   :  { %v1526_v25 = vpop.f32.mrb[38].mxu0 }
0x14bf   :  { %v1527_v26 = vadd.f32 %v1526_v25, %v3076_v38  ;;  %v2400_v27 = vpop.f32.mrb[39].mxu0  ;;  %v1530_v28 = vsel %vm469_vm3, %v1524_v22, -inf }
0x14c0   :  { %1531 = vmax.xlane.f32.xlu0 %v1530_v28 }
0x14c1   :  { %v1533_v29 = vsel %vm469_vm3, %v1527_v26, -inf }
0x14c4   :  { %1534 = vmax.xlane.f32.xlu0 %v1533_v29  ;;  %v1644_v30 = vpop.f32.mrb[40].mxu0 }
0x14c5   :  { %v1645_v31 = vadd.f32 %v1644_v30, %v3074_v36  ;;  %v2411_v59 = vpop.f32.mrb[41].mxu0 }
0x14c6   :  { %v1647_v32 = vpop.f32.mrb[42].mxu0 }
0x14c7   :  { %v1648_v34 = vadd.f32 %v1647_v32, %v3076_v38  ;;  %v2412_v35 = vpop.f32.mrb[43].mxu0  ;;  %v1651_v37 = vsel %vm469_vm3, %v1645_v31, -inf }
0x14c8   :  { %1652 = vmax.xlane.f32.xlu0 %v1651_v37 }
0x14c9   :  { %v1654_v39 = vsel %vm469_vm3, %v1648_v34, -inf }
0x14ca   :  { %1655 = vmax.xlane.f32.xlu1 %v1654_v39 }
0x1545   :  { %v1411_v40 = vpop.xlane.xlu0 %1410 }
0x1546   :  { %v1415_v10 = vsub.f32 %v1403_v15, %v1411_v40 }
0x1547   :  { %v1414_v41 = vpop.xlane.xlu1 %1413 }
0x1548   :  { %v1417_v42 = vmul.f32 1.442695, %v1415_v10  ;;  %v1416_v43 = vsub.f32 %v1406_v5, %v1414_v41 }
0x154a   :  { %2575 = vpow2.f32 %v1417_v42  ;;  %v1419_v44 = vmul.f32 1.442695, %v1416_v43 }
0x154c   :  { %2577 = vpow2.f32 %v1419_v44 }
0x154d   :  { %v1532_v36 = vpop.xlane.xlu0 %1531 }
0x154e   :  { %v1536_v33 = vsub.f32 %v1524_v22, %v1532_v36 }
0x1550   :  { %v1538_v45 = vmul.f32 1.442695, %v1536_v33 }
0x1551   :  { %v1535_v46 = vpop.xlane.xlu0 %1534 }
0x1552   :  { %2579 = vpow2.f32 %v1538_v45  ;;  %v1537_v38 = vsub.f32 %v1527_v26, %v1535_v46 }
0x1554   :  { %v2576_v47 = vpop.eup %2575  ;;  %v1540_v48 = vmul.f32 1.442695, %v1537_v38 }
0x1555   :  { %v1653_v50 = vpop.xlane.xlu0 %1652  ;;  %v1421_v51 = vsel %vm469_vm3, %v2576_v47, 0.0 }
0x1556   :  { %v2578_v53 = vpop.eup %2577  ;;  %2581 = vpow2.f32 %v1540_v48  ;;  %v1657_v54 = vsub.f32 %v1645_v31, %v1653_v50  ;;  %1422 = vadd.xlane.f32.xlu0 %v1421_v51 }
0x1557   :  { %v1424_v55 = vsel %vm469_vm3, %v2578_v53, 0.0  ;;  %v1656_v63 = vpop.xlane.xlu1 %1655 }
0x1558   :  { %v1659_v56 = vmul.f32 1.442695, %v1657_v54  ;;  %1425 = vadd.xlane.f32.xlu1 %v1424_v55  ;;  %v1658_v0 = vsub.f32 %v1648_v34, %v1656_v63 }
0x155a   :  { %2583 = vpow2.f32 %v1659_v56  ;;  %v1661_v1 = vmul.f32 1.442695, %v1658_v0 }
0x155c   :  { %v2580_v21 = vpop.eup %2579  ;;  %2585 = vpow2.f32 %v1661_v1 }
0x155d   :  { %v1542_v58 = vsel %vm469_vm3, %v2580_v21, 0.0 }
0x155e   :  { %1543 = vadd.xlane.f32.xlu0 %v1542_v58 }
0x1560   :  { %v2582_v60 = vpop.eup %2581 }
0x1561   :  { %v1545_v61 = vsel %vm469_vm3, %v2582_v60, 0.0 }
0x1562   :  { %1546 = vadd.xlane.f32.xlu1 %v1545_v61 }
0x1564   :  { %v2584_v24 = vpop.eup %2583 }
0x1565   :  { %v1663_v62 = vsel %vm469_vm3, %v2584_v24, 0.0 }
0x1566   :  { %1664 = vadd.xlane.f32.xlu0 %v1663_v62  ;;  %v2586_v2 = vpop.eup %2585 }
0x1567   :  { %v1666_v14 = vsel %vm469_vm3, %v2586_v2, 0.0 }
0x1573   :  { %1553 = vrot.lane.b32.xlu1 %v3315_v57, %s2648_s19 }
0x157c   :  { %1432 = vrot.lane.b32.xlu0 %v3315_v57, %s2645_s16 }
0x1597   :  { %1667 = vadd.xlane.f32.xlu1 %v1666_v14 }
0x15a8   :  { %1674 = vrot.lane.b32.xlu1 %v3315_v57, %s2651_s22 }
0x15ac   :  { %1754 = vrot.lane.b32.xlu1 %v3295_v3, %s2649_s20 }
0x15e3   :  { %v1423_v12 = vpop.xlane.xlu0 %1422 }
0x15e5   :  { %v1426_v8 = vpop.xlane.xlu1 %1425 }
0x15e6   :  { %2587 = vrcp.f32 %v1426_v8 }
0x15e7   :  { %2589 = vrcp.f32 %v1423_v12 }
0x15eb   :  { %v1544_v13 = vpop.xlane.xlu0 %1543 }
0x15ef   :  { %v1547_v15 = vpop.xlane.xlu1 %1546 }
0x15f0   :  { %2591 = vrcp.f32 %v1547_v15  ;;  %v2588_v16 = vpop.eup %2587 }
0x15f1   :  { %2593 = vrcp.f32 %v1544_v13  ;;  %v2590_v5 = vpop.eup %2589  ;;  %v1430_v7 = vmul.f32 %v2588_v16, %v2578_v53 }
0x15f2   :  { %v1429_v18 = vmul.f32 %v2590_v5, %v2576_v47 }
0x15f3   :  { %v1665_v17 = vpop.xlane.xlu0 %1664  ;;  %v1554_v3 = vpop.permute.xlu1 %1553 }
0x15f4   :  { %v1431_v20 = vpack.c.bf16 %v1430_v7, %v1429_v18  ;;  %2595 = vrcp.f32 %v1665_v17 }
0x15f7   :  { %v1433_v19 = vpop.permute.xlu0 %1432 }
0x15f8   :  { %2390 = vmatpush3.bf16.msra.mxu1 %v1433_v19 }
0x15f9   :  { %2401 = vmatprep.subr.bf16.mxu1 %v2637_v11 }
0x15fa   :  { %v2592_v57 = vpop.eup %2591 }
0x15fb   :  { %2392 = vmatmul.mubr.msk.bf16.vlgmr.msra.gmra.mrb[40].mxu1 %vm469_vm3, %v1431_v20  ;;  %v2594_v22 = vpop.eup %2593  ;;  %v1551_v23 = vmul.f32 %v2592_v57, %v2582_v60 }
0x15fc   :  { %2402 = vmatpush3.bf16.msra.mxu1 %v1554_v3  ;;  %2403 = vmatprep.mubr.msk.bf16.mxu1 %vm2638_vm1, %v2637_v11  ;;  %v1550_v25 = vmul.f32 %v2594_v22, %v2580_v21 }
0x15fd   :  { %2413 = vmatprep.subr.bf16.mxu1 %v2637_v11 }
0x15fe   :  { %v1552_v26 = vpack.c.bf16 %v1551_v23, %v1550_v25  ;;  %v2596_v29 = vpop.eup %2595  ;;  %v1140_v25 = vld [vmem:[%s3564_s2 + $0x18] sm:$0xff] }
0x15ff   :  { %v1671_v31 = vmul.f32 %v2596_v29, %v2584_v24  ;;  %v1143_v29 = vld [vmem:[%s3564_s2 + $0x90] sm:$0xff] }
0x1603   :  { %2404 = vmatmul.mubr.msk.bf16.vlgmr.msra.gmra.mrb[44].mxu1 %vm469_vm3, %v1552_v26  ;;  %v1141_v26 = vld [vmem:[%s3564_s2 + $0x40] sm:$0xff] }
0x1604   :  { %2415 = vmatprep.mubr.msk.bf16.mxu1 %vm2638_vm1, %v2637_v11 }
0x1624   :  { %v1668_v27 = vpop.xlane.xlu1 %1667 }
0x1625   :  { %2597 = vrcp.f32 %v1668_v27  ;;  %v1835_v27 = vpack.c.bf16 %v1141_v26, %v1140_v25 }
0x1628   :  { %v1675_v28 = vpop.permute.xlu1 %1674 }
0x1629   :  { %2414 = vmatpush3.bf16.msra.mxu1 %v1675_v28  ;;  %v1142_v28 = vld [vmem:[%s3564_s2 + $0x68] sm:$0xff] }
0x162a   :  { %2427 = vmatprep.subr.bf16.mxu1 %v2637_v11 }
0x162c   :  { %v1755_v34 = vpop.permute.xlu1 %1754 }
0x162d   :  { %2420 = vmatpush3.bf16.msra.mxu0 %v1755_v34 }
0x162e   :  { %2421 = vmatprep.subr.bf16.mxu0 %v2637_v11 }
0x162f   :  { %v2598_v30 = vpop.eup %2597 }
0x1630   :  { %v1672_v59 = vmul.f32 %v2598_v30, %v2586_v2  ;;  %v1836_v30 = vpack.c.bf16 %v1143_v29, %v1142_v28 }
0x1632   :  { %v1673_v32 = vpack.c.bf16 %v1672_v59, %v1671_v31 }
0x1634   :  { %2416 = vmatmul.mubr.msk.bf16.vlgmr.msra.gmra.mrb[48].mxu1 %vm469_vm3, %v1673_v32 }
0x1635   :  { %2431 = vmatprep.mubr.msk.bf16.mxu1 %vm2638_vm1, %v2637_v11  ;;  %2428 = vmatpush3.bf16.msra.mxu1 %v1835_v27 }
0x1636   :  { %2429 = vmatprep.subr.bf16.mxu1 %v2637_v11 }
0x1639   :  { %2430 = vmatpush3.bf16.msra.mxu1 %v1836_v30 }
0x163a   :  { %2455 = vmatprep.subr.bf16.mxu1 %v2637_v11 }
0x16ce   :  { %v1472_v35 = vpop.f32.mrb[40].mxu1 }
0x16cf   :  { %v2393_v37 = vpop.f32.mrb[41].mxu1 }
0x16d0   :  { %v1475_v39 = vpop.f32.mrb[42].mxu1 }
0x16d1   :  { %v2504_v40 = vpack.i.bf16 %v1475_v39, %v1472_v35  ;;  %v2394_v10 = vpop.f32.mrb[43].mxu1 }
0x16d3   :  { %2505 = vrot.lane.b32.xlu0 %v2504_v40, %s2650_s21 }
0x16d6   :  { %v1593_v41 = vpop.f32.mrb[44].mxu1 }
0x16d7   :  { %v2405_v42 = vpop.f32.mrb[45].mxu1 }
0x16d8   :  { %v1596_v43 = vpop.f32.mrb[46].mxu1 }
0x16d9   :  { %v2509_v44 = vpack.i.bf16 %v1596_v43, %v1593_v41  ;;  %v2406_v36 = vpop.f32.mrb[47].mxu1  ;;  %v1144_v43 = vld [vmem:[%s3563_s1 + $0x380] sm:$0xff] }
0x16db   :  { %2510 = vrot.lane.b32.xlu1 %v2509_v44, %s2652_s23  ;;  %v1145_v44 = vld [vmem:[%s3563_s1 + $0x388] sm:$0xff] }
0x16dc   :  { %v1900_v36 = vpack.c.bf16 %v1145_v44, %v1144_v43 }
0x16df   :  { %1756 = vrot.lane.b32.xlu1 %v3305_v6, %s2649_s20 }
0x1707   :  { %v1714_v33 = vpop.f32.mrb[48].mxu1 }
0x1708   :  { %v2417_v45 = vpop.f32.mrb[49].mxu1 }
0x1709   :  { %v1717_v46 = vpop.f32.mrb[50].mxu1  ;;  %v1147_v45 = vld [vmem:[%s3563_s1 + $0x398] sm:$0xff] }
0x170a   :  { %v2514_v38 = vpack.i.bf16 %v1717_v46, %v1714_v33  ;;  %v2418_v47 = vpop.f32.mrb[51].mxu1  ;;  %v1146_v33 = vld [vmem:[%s3563_s1 + $0x390] sm:$0xff] }
0x170b   :  { %v1901_v46 = vpack.c.bf16 %v1147_v45, %v1146_v33  ;;  %v1149_v47 = vld [vmem:[%s3563_s1 + $0x3a8] sm:$0xff] }
0x170c   :  { %2515 = vrot.lane.b32.xlu0 %v2514_v38, %s2653_s24  ;;  %v1148_v38 = vld [vmem:[%s3563_s1 + $0x3a0] sm:$0xff] }
0x1745   :  { %v2506_v51 = vpop.permute.xlu0 %2505 }
0x1746   :  { %v2508_v53 = vunpack.i.h.bf16 %v2506_v51  ;;  %v2507_v54 = vunpack.i.l.bf16 %v2506_v51  ;;  %v1151_v51 = vld [vmem:[%s3563_s1 + $0x3b8] sm:$0xff] }
0x1748   :  { %v1746_v6 = vsel %vm421_vm2, %v3366_v9, %v2508_v53  ;;  %v1745_v58 = vsel %vm421_vm2, %v3364_v4, %v2507_v54  ;;  %v1161_v4 = vld [vmem:[%s3565_s3 + $0x5] ss:$0 sm:$0xff] }
0x1749   :  { %v1152_v54 = vld [vmem:[%s3563_s1 + $0x3c0] sm:$0xff] }
0x174d   :  { %v2511_v48 = vpop.permute.xlu1 %2510 }
0x174e   :  { %v2513_v55 = vunpack.i.h.bf16 %v2511_v48  ;;  %v2512_v56 = vunpack.i.l.bf16 %v2511_v48  ;;  %v1902_v48 = vpack.c.bf16 %v1149_v47, %v1148_v38  ;;  %v1974_v38 = vld [vmem:[%s3564_s2 + $0x70] sm:$0xff] }
0x1750   :  { %v1748_v24 = vsel %vm469_vm3, %v1746_v6, %v2513_v55  ;;  %v1747_v62 = vsel %vm469_vm3, %v1745_v58, %v2512_v56  ;;  %v1153_v55 = vld [vmem:[%s3563_s1 + $0x3c8] sm:$0xff]  ;;  %v1155_v6 = vld [vmem:[%s3563_s1 + $0x3d8] sm:$0xff] }
0x1751   :  { %v1757_v50 = vpop.permute.xlu1 %1756  ;;  %v1904_v56 = vpack.c.bf16 %v1153_v55, %v1152_v54 }
0x1752   :  { %2422 = vmatpush3.bf16.msra.mxu0 %v1757_v50  ;;  %v1150_v50 = vld [vmem:[%s3563_s1 + $0x3b0] sm:$0xff] }
0x1753   :  { %2435 = vmatprep.subr.bf16.mxu0 %v2637_v11  ;;  %v1903_v53 = vpack.c.bf16 %v1151_v51, %v1150_v50 }
0x177e   :  { %v2516_v21 = vpop.permute.xlu0 %2515 }
0x177f   :  { %v2518_v60 = vunpack.i.h.bf16 %v2516_v21  ;;  %v2517_v61 = vunpack.i.l.bf16 %v2516_v21  ;;  %v1154_v21 = vld [vmem:[%s3563_s1 + $0x3d0] sm:$0xff] }
0x1780   :  { %v1905_v58 = vpack.c.bf16 %v1155_v6, %v1154_v21 }
0x1781   :  { %v1750_v63 = vsel %vm931_vm4, %v1748_v24, %v2518_v60  ;;  %v1749_v0 = vsel %vm931_vm4, %v1747_v62, %v2517_v61  ;;  %v1156_v60 = vld [vmem:[%s3563_s1 + $0x3e0] sm:$0xff]  ;;  %v1157_v61 = vld [vmem:[%s3563_s1 + $0x3e8] sm:$0xff]  ;;  %v1158_v62 = vld [vmem:[%s3563_s1 + $0x3f0] sm:$0xff] }
0x1782   :  { %v1751_v1 = vpack.c.bf16 %v1750_v63, %v1749_v0  ;;  %v1906_v24 = vpack.c.bf16 %v1157_v61, %v1156_v60  ;;  %v1159_v63 = vld [vmem:[%s3563_s1 + $0x3f8] sm:$0xff]  ;;  %v1976_v60 = vld [vmem:[%s3565_s3 + $0x10] ss:$0 sm:$0xff] }
0x1783   :  { %v1907_v0 = vpack.c.bf16 %v1159_v63, %v1158_v62 }
0x1784   :  { %2424 = vmatmul.mubr.msk.bf16.vlgmr.msra.gmra.mrb[44].mxu0 %vm334_vm0, %v1751_v1  ;;  %v1162_v1 = vld [vmem:[%s3565_s3 + $0x6] ss:$0 sm:$0xff] }
0x1785   :  { %2451 = vmatprep.mubr.msk.bf16.mxu0 %vm2638_vm1, %v2637_v11  ;;  %2436 = vmatpush3.bf16.msra.mxu0 %v1900_v36 }
0x1786   :  { %2437 = vmatprep.subr.bf16.mxu0 %v2637_v11 }
0x1789   :  { %2438 = vmatpush3.bf16.msra.mxu0 %v1901_v46  ;;  %v1973_v46 = vld [vmem:[%s3564_s2 + $0x48] sm:$0xff] }
0x178a   :  { %2439 = vmatprep.subr.bf16.mxu0 %v2637_v11 }
0x178d   :  { %2440 = vmatpush3.bf16.msra.mxu0 %v1902_v48  ;;  %v1975_v48 = vld [vmem:[%s3564_s2 + $0x98] sm:$0xff] }
0x178e   :  { %2441 = vmatprep.subr.bf16.mxu0 %v2637_v11  ;;  %v1980_v50 = vpack.c.bf16 %v1975_v48, %v1974_v38 }
0x1791   :  { %2442 = vmatpush3.bf16.msra.mxu0 %v1903_v53 }
0x1792   :  { %2443 = vmatprep.subr.bf16.mxu0 %v2637_v11 }
0x1795   :  { %2444 = vmatpush3.bf16.msra.mxu0 %v1904_v56 }
0x1796   :  { %2445 = vmatprep.subr.bf16.mxu0 %v2637_v11 }
0x1799   :  { %2446 = vmatpush3.bf16.msra.mxu0 %v1905_v58 }
0x179a   :  { %2447 = vmatprep.subr.bf16.mxu0 %v2637_v11 }
0x179d   :  { %2448 = vmatpush3.bf16.msra.mxu0 %v1906_v24 }
0x179e   :  { %2449 = vmatprep.subr.bf16.mxu0 %v2637_v11 }
0x17a1   :  { %2450 = vmatpush3.bf16.msra.mxu0 %v1907_v0 }
0x1857   :  { %v1797_v9 = vpop.f32.mrb[44].mxu0 }
0x1858   :  { %v1804_v2 = vadd.f32 %v1797_v9, %v3276_v49  ;;  %v2425_v14 = vpop.f32.mrb[45].mxu0 }
0x1859   :  { %v1800_v8 = vpop.f32.mrb[46].mxu0 }
0x185a   :  { %v3428_v12 = vadd.f32 %v1804_v2, %v1161_v4  ;;  %v1805_v13 = vadd.f32 %v1800_v8, %v3279_v52  ;;  %v2426_v15 = vpop.f32.mrb[47].mxu0 }
0x185c   :  { %v3431_v16 = vadd.f32 %v1805_v13, %v1161_v4  ;;  %v1808_v17 = vsel %vm334_vm0, %v3428_v12, 0.0 }
0x185d   :  { %1809 = vadd.xlane.f32.xlu0 %v1808_v17 }
0x185e   :  { %v1811_v5 = vsel %vm334_vm0, %v3431_v16, 0.0 }
0x185f   :  { %1812 = vadd.xlane.f32.xlu1 %v1811_v5 }
0x18ea   :  { %v1810_v7 = vpop.xlane.xlu0 %1809 }
0x18eb   :  { %v1814_v18 = vmul.f32 0.03125, %v1810_v7 }
0x18ec   :  { %v1813_v49 = vpop.xlane.xlu1 %1812 }
0x18ed   :  { %v1816_v19 = vsub.f32 %v3428_v12, %v1814_v18  ;;  %v1815_v20 = vmul.f32 0.03125, %v1813_v49 }
0x18ef   :  { %v1817_v57 = vsub.f32 %v3431_v16, %v1815_v20  ;;  %v1818_v52 = vmul.f32 %v1816_v19, %v1816_v19 }
0x18f1   :  { %v1820_v3 = vsel %vm334_vm0, %v1818_v52, 0.0  ;;  %v1819_v22 = vmul.f32 %v1817_v57, %v1817_v57 }
0x18f2   :  { %1821 = vadd.xlane.f32.xlu0 %v1820_v3 }
0x18f3   :  { %v1823_v23 = vsel %vm334_vm0, %v1819_v22, 0.0 }
0x18f6   :  { %1824 = vadd.xlane.f32.xlu0 %v1823_v23 }
0x197f   :  { %v1822_v31 = vpop.xlane.xlu0 %1821 }
0x1980   :  { %v1826_v59 = vmul.f32 0.03125, %v1822_v31 }
0x1982   :  { %v1828_v32 = vadd.f32 1e-06, %v1826_v59 }
0x1983   :  { %v1825_v34 = vpop.xlane.xlu0 %1824 }
0x1984   :  { %v1827_v35 = vmul.f32 0.03125, %v1825_v34  ;;  %2599 = vrsqrt.f32 %v1828_v32 }
0x1986   :  { %v1829_v37 = vadd.f32 1e-06, %v1827_v35 }
0x1988   :  { %2601 = vrsqrt.f32 %v1829_v37 }
0x198e   :  { %v2600_v39 = vpop.eup %2599 }
0x198f   :  { %v1832_v10 = vmul.f32 %v2600_v39, %v1816_v19  ;;  %v1163_v39 = vld [vmem:[%s3565_s3 + $0x7] ss:$0 sm:$0xff] }
0x1992   :  { %v2602_v40 = vpop.eup %2601 }
0x1993   :  { %v1833_v41 = vmul.f32 %v2602_v40, %v1817_v57 }
0x1995   :  { %v1834_v42 = vpack.c.bf16 %v1833_v41, %v1832_v10 }
0x1997   :  { %2432 = vmatmul.mubr.msk.bf16.vlgmr.msra.gmra.mrb[52].mxu1 %vm334_vm0, %v1834_v42 }
0x1998   :  { %2459 = vmatprep.mubr.msk.bf16.mxu1 %vm2638_vm1, %v2637_v11 }
0x1a6a   :  { %v1874_v4 = vpop.f32.mrb[52].mxu1 }
0x1a6b   :  { %v1875_v9 = vadd.f32 %v1874_v4, %v1162_v1  ;;  %v2433_v2 = vpop.f32.mrb[53].mxu1 }
0x1a6c   :  { %v1877_v14 = vpop.f32.mrb[54].mxu1 }
0x1a6d   :  { %v1881_v8 = vmul.f32 %v1875_v9, %v1875_v9  ;;  %v1878_v13 = vadd.f32 %v1877_v14, %v1162_v1  ;;  %v2434_v15 = vpop.f32.mrb[55].mxu1 }
0x1a6f   :  { %v1883_v17 = vmul.f32 %v1881_v8, %v1875_v9  ;;  %v1882_v5 = vmul.f32 %v1878_v13, %v1878_v13 }
0x1a71   :  { %v1885_v7 = vmul.f32 0.044715, %v1883_v17  ;;  %v1884_v18 = vmul.f32 %v1882_v5, %v1878_v13 }
0x1a73   :  { %v1887_v49 = vadd.f32 %v1885_v7, %v1875_v9  ;;  %v1886_v19 = vmul.f32 0.044715, %v1884_v18 }
0x1a75   :  { %v1889_v20 = vmul.f32 0.7978846, %v1887_v49  ;;  %v1888_v57 = vadd.f32 %v1886_v19, %v1878_v13 }
0x1a77   :  { %2603 = vtanh.f32 %v1889_v20  ;;  %v1890_v52 = vmul.f32 0.7978846, %v1888_v57 }
0x1a79   :  { %2605 = vtanh.f32 %v1890_v52 }
0x1a81   :  { %v2604_v3 = vpop.eup %2603 }
0x1a82   :  { %v1893_v22 = vadd.f32 1.0, %v2604_v3 }
0x1a83   :  { %v2606_v23 = vpop.eup %2605 }
0x1a84   :  { %v1895_v25 = vmul.f32 0.5, %v1893_v22  ;;  %v1894_v26 = vadd.f32 1.0, %v2606_v23 }
0x1a86   :  { %v1896_v27 = vmul.f32 0.5, %v1894_v26  ;;  %v1897_v28 = vmul.f32 %v1895_v25, %v1875_v9  ;;  %v1977_v9 = vld [vmem:[%s3565_s3 + $0x11] ss:$0 sm:$0xff]  ;;  %s2654_s3 = smov [#allocation2]  }
0x1a87   :  { %s2099_s14 = sshll.u32 %s2654_s3, 4  ;;  %s2100_s14 = int_to_ptr.vmem [resolvable:$true] %s2099_s14 }
0x1a88   :  { %v1898_v29 = vmul.f32 %v1896_v27, %v1878_v13  ;;  %s2613_s15 = scalar_lea.vmem %s2100_s14, 32  ;;  %p2618_p1 = scmp.lt.s32.totalorder %s2100_s14, %s2100_s14 }
0x1a89   :  { %p2614_p0 = scmp.ne.s32.totalorder %s2100_s14, %s2613_s15  ;;  %p2619_p2 = scmp.lt.s32.totalorder %s2613_s15, %s2613_s15 }
0x1a8a   :  { %v1899_v30 = vpack.c.bf16 %v1898_v29, %v1897_v28 }
0x1a8b   :  { %p2620_p3 = por %p2619_p2, %p2618_p1 }
0x1a8c   :  { %2452 = vmatmul.mubr.bf16.vlgmr.msra.gmra.mrb[48].mxu0 %v1899_v30 }
0x1a8d   :  { %p2621_p4 = pnand %p2620_p3, %p2614_p0 }
0x1b5f   :  { %v1942_v31 = vpop.f32.mrb[48].mxu0 }
0x1b60   :  { %v2453_v59 = vpop.f32.mrb[49].mxu0  ;;  %v1949_v34 = vadd.f32 %v1942_v31, %v3428_v12 }
0x1b61   :  { %v1945_v32 = vpop.f32.mrb[50].mxu0 }
0x1b62   :  { %v1950_v35 = vadd.f32 %v1945_v32, %v3431_v16  ;;  %v2454_v37 = vpop.f32.mrb[51].mxu0  ;;  %v1951_v10 = vadd.f32 %v1949_v34, %v1163_v39  ;;  %v1972_v16 = vld [vmem:[%s3564_s2 + $0x20] sm:$0xff] }
0x1b63   :  { %v1979_v47 = vpack.c.bf16 %v1973_v46, %v1972_v16 }
0x1b64   :  { %v1952_v40 = vadd.f32 %v1950_v35, %v1163_v39 }
0x1b65   :  { %2456 = vmatpush3.bf16.msra.mxu1 %v1979_v47 }
0x1b66   :  { %v1954_v41 = vrot.slane %v1952_v40, 7  ;;  %2457 = vmatprep.subr.bf16.mxu1 %v2637_v11 }
0x1b68   :  { %v1957_v42 = vsel %vm1956_vm5, %v1951_v10, %v1954_v41 }
0x1b69   :  { %v1959_v43 = vsel %vm1958_vm6, %v1957_v42, 0.0  ;;  %2458 = vmatpush3.bf16.msra.mxu1 %v1980_v50 }
0x1b6a   :  { %1960 = vadd.xlane.f32.xlu0 %v1959_v43  ;;  %2463 = vmatprep.subr.bf16.mxu1 %v2637_v11 }
0x1b80   :  { %2028 = vrot.lane.b32.xlu0 %v1979_v47, %s2639_s8 }
0x1bf7   :  { %v1961_v44 = vpop.xlane.xlu0 %1960 }
0x1bf8   :  { %v1962_v36 = vmul.f32 0.03125, %v1961_v44 }
0x1bfa   :  { %v1963_v33 = vsub.f32 %v1957_v42, %v1962_v36 }
0x1bfb   :  { %v2029_v6 = vpop.permute.xlu0 %2028 }
0x1bfc   :  { %v1964_v45 = vmul.f32 %v1963_v33, %v1963_v33 }
0x1bfe   :  { %v1965_v12 = vsel %vm1958_vm6, %v1964_v45, 0.0 }
0x1bff   :  { %1966 = vadd.xlane.f32.xlu1 %v1965_v12 }
0x1c10   :  { %2030 = vrot.lane.b32.xlu1 %v1980_v50, %s2639_s8 }
0x1c8c   :  { %v1967_v51 = vpop.xlane.xlu1 %1966 }
0x1c8d   :  { %v1968_v53 = vmul.f32 0.03125, %v1967_v51 }
0x1c8f   :  { %v1969_v54 = vadd.f32 1e-06, %v1968_v53 }
0x1c90   :  { %v2031_v58 = vpop.permute.xlu1 %2030 }
0x1c91   :  { %2607 = vrsqrt.f32 %v1969_v54 }
0x1c9b   :  { %v2608_v55 = vpop.eup %2607 }
0x1c9c   :  { %v1971_v56 = vmul.f32 %v2608_v55, %v1963_v33 }
0x1c9e   :  { %v1978_v21 = vpack.c.bf16 %v1971_v56, %v1971_v56 }
0x1ca0   :  { %2460 = vmatmul.mubr.msk.bf16.vlgmr.msra.gmra.mrb[56].mxu1 %vm334_vm0, %v1978_v21 }
0x1ca1   :  { %2464 = vmatpush3.bf16.msra.mxu1 %v2029_v6  ;;  %2467 = vmatprep.mubr.msk.bf16.mxu1 %vm2638_vm1, %v2637_v11 }
0x1ca2   :  { %2465 = vmatprep.subr.bf16.mxu1 %v2637_v11 }
0x1ca5   :  { %2466 = vmatpush3.bf16.msra.mxu1 %v2031_v58 }
0x1d73   :  { %v2018_v61 = vpop.f32.mrb[56].mxu1 }
0x1d74   :  { %v2019_v24 = vadd.f32 %v2018_v61, %v1976_v60  ;;  %v2461_v62 = vpop.f32.mrb[57].mxu1 }
0x1d75   :  { %v2021_v63 = vpop.f32.mrb[58].mxu1 }
0x1d76   :  { %v2024_v0 = vmax.f32 %v2019_v24, 0.0  ;;  %v2462_v1 = vpop.f32.mrb[59].mxu1 }
0x1d78   :  { %v2025_v4 = vpack.c.bf16 %v2024_v0, %v2024_v0 }
0x1d7a   :  { %2468 = vmatmul.mubr.msk.bf16.vlgmr.msra.gmra.mrb[60].mxu1 %vm334_vm0, %v2025_v4 }
0x1e4d   :  { %v2071_v11 = vpop.f32.mrb[60].mxu1 }
0x1e4e   :  { %v2072_v2 = vadd.f32 %v2071_v11, %v1977_v9  ;;  %v2469_v14 = vpop.f32.mrb[61].mxu1 }
0x1e4f   :  { %v2074_v8 = vpop.f32.mrb[62].mxu1 }
0x1e50   :  { %v2470_v13 = vpop.f32.mrb[63].mxu1  ;;  %v2077_v15 = vmul.f32 %v2072_v2, %v2072_v2 }
0x1e52   :  { %v2079_v17 = vsel %vm2078_vm7, %v2077_v15, 0.0 }
0x1e53   :  { %2080 = vadd.xlane.f32.xlu1 %v2079_v17 }
0x1ee0   :  { %v2081_v5 = vpop.xlane.xlu1 %2080 }
0x1ee1   :  { %2609 = vrsqrt.f32 %v2081_v5  ;;  %vm2084_vm8 = vcmp.eq.f32.partialorder %v2081_v5, inf  ;;  %v2087_v49 = vand.u32 2147483648, %v2081_v5  ;;  %vm2086_vm9 = vcmp.eq.f32.partialorder %v2081_v5, 0.0 }
0x1eeb   :  { %v2610_v7 = vpop.eup %2609 }
0x1eec   :  { %v2083_v18 = vmul.f32 %v2610_v7, %v2081_v5 }
0x1eee   :  { %v2085_v19 = vsel %vm2084_vm8, %v2081_v5, %v2083_v18 }
0x1eef   :  { %v2088_v20 = vsel %vm2086_vm9, %v2087_v49, %v2085_v19 }
0x1ef0   :  { %v2089_v57 = vmax.f32 %v2088_v20, 1e-12 }
0x1ef2   :  { %2611 = vrcp.f32 %v2089_v57 }
0x1efc   :  { %v2612_v52 = vpop.eup %2611 }
0x1efd   :  { %v2091_v3 = vmul.f32 %v2612_v52, %v2072_v2 }
0x1eff   :  { %2092 = vst.msk [vmem:[#allocation2] sm:$0x3] %vm2078_vm7, %v2091_v3 }
0x1f00   :  { %2624 = shalt.err (!%p2621_p4)
}
0x1f01   :  { %s2625_s18 = scalar_lea.hbm %s3566_s4, 32 }
0x1f02   :  { %p2626_p5 = scmp.ne.s32.totalorder %s3566_s4, %s2625_s18  ;;  %p2629_p6 = scmp.lt.u32.totalorder %s2625_s18, %s3566_s4 }
0x1f04   :  { %p2631_p7 = pnand %p2629_p6, %p2626_p5 }
0x1f06   :  { %2634 = shalt.err (!%p2631_p7)
}
0x1f07   :  { %2102 = dma.vmem_to_hbm [thread:$0]  %s2100_s14, 32, %s3566_s4, [#allocation3]  }
0x1f08   :  { %2635 = dma.done.wait [#allocation3], 32  }
0x1f09   :  { %2636 = vsyncadd [#allocation3], 4294967264 }
0x1f0a   :  { %2106 = vsyncpa [#allocation3], 1 }

</bundles_post_ra>
